<compile_context>
chip_gen: v7x
topology: tpu7x:2x2x1
jax: 0.10.0
libtpu: 0.0.40
codegen_flags: <defaults>
</compile_context>

<pallas_src>
import functools
import math

import jax
import jax.numpy as jnp
from jax import lax
from jax.experimental import pallas as pl
from jax.experimental.pallas import tpu as pltpu

_VMEM = pl.BlockSpec(memory_space=pltpu.MemorySpace.VMEM)
_EPS = 1e-5


def _elu(h):
    # ELU(alpha=1); exp is only taken of the clamped non-positive branch.
    return jnp.where(h > 0, h, jnp.exp(jnp.minimum(h, 0.0)) - 1.0)


# --------------------------------------------------------------------------- fused kernel

def _mlp_encoder_kernel(x_ref, rr_ref, rs_ref, rrt_ref, *rest, n_atoms, eps):
    """Fused forward pass of MLPEncoder (factor=True).

    x_ref  : [B*N, n_in]   flattened node trajectories (n_in = T * D)
    rr_ref : [B*E, B*N]    block-diagonal rel_rec
    rs_ref : [B*E, B*N]    block-diagonal rel_send
    rrt_ref: [B*N, B*E]    rr^T (precomputed in the wrapper; avoids in-kernel transpose)
    rest   : 4 x (w1, b1, w2, b2, gamma, beta) for mlp1..mlp4, then (w_out, b_out), then o_ref
    """
    (w11, b11, w12, b12, g1, be1,
     w21, b21, w22, b22, g2, be2,
     w31, b31, w32, b32, g3, be3,
     w41, b41, w42, b42, g4, be4,
     wo, bo, o_ref) = rest

    def mlp(x, w1, b1, w2, b2, g, be):
        h = jnp.dot(x, w1[...], preferred_element_type=jnp.float32) + b1[...]
        h = _elu(h)
        # F.dropout(p=0.0) is the identity
        h = jnp.dot(h, w2[...], preferred_element_type=jnp.float32) + b2[...]
        h = _elu(h)
        # BatchNorm1d, training-mode batch statistics over ALL rows (biased variance)
        mean = jnp.mean(h, axis=0, keepdims=True)
        var = jnp.mean((h - mean) ** 2, axis=0, keepdims=True)
        return (h - mean) * lax.rsqrt(var + eps) * g[...] + be[...]

    rr = rr_ref[...]
    rs = rs_ref[...]
    rrt = rrt_ref[...]

    # mlp1 over nodes: [B*N, n_in] -> [B*N, H]
    x = mlp(x_ref[...], w11, b11, w12, b12, g1, be1)

    # node2edge: edges = cat([senders, receivers])
    senders = jnp.dot(rs, x, preferred_element_type=jnp.float32)
    receivers = jnp.dot(rr, x, preferred_element_type=jnp.float32)
    x = mlp(jnp.concatenate([senders, receivers], axis=-1),
            w21, b21, w22, b22, g2, be2)                                   # [B*E, H]
    x_skip = x

    # edge2node: incoming / N
    nodes = jnp.dot(rrt, x, preferred_element_type=jnp.float32) * (1.0 / n_atoms)
    nodes = mlp(nodes, w31, b31, w32, b32, g3, be3)                        # [B*N, H]

    # node2edge again, concat skip, mlp4
    senders = jnp.dot(rs, nodes, preferred_element_type=jnp.float32)
    receivers = jnp.dot(rr, nodes, preferred_element_type=jnp.float32)
    x = jnp.concatenate([senders, receivers, x_skip], axis=-1)             # [B*E, 3H]
    x = mlp(x, w41, b41, w42, b42, g4, be4)                                # [B*E, H]

    # fc_out
    o_ref[...] = jnp.dot(x, wo[...], preferred_element_type=jnp.float32) + bo[...]


# --------------------------------------------------------------------------- wrapper

def mlp_encoder(inputs, rel_rec, rel_send, params, *, eps=_EPS):
    """inputs: [B, N, T, D]; rel_rec/rel_send: [E, N]; returns [B, E, n_out]."""
    B, N, T, D = inputs.shape
    E = rel_rec.shape[0]
    n_in = T * D
    n_out = params['w_out'].shape[-1]

    x2d = inputs.reshape(B * N, n_in).astype(jnp.float32)
    eye_b = jnp.eye(B, dtype=jnp.float32)
    rr_bd = jnp.kron(eye_b, rel_rec.astype(jnp.float32))    # [B*E, B*N] block-diagonal
    rs_bd = jnp.kron(eye_b, rel_send.astype(jnp.float32))
    rrt_bd = rr_bd.T                                        # [B*N, B*E]

    flat = [x2d, rr_bd, rs_bd, rrt_bd]
    for name in ('mlp1', 'mlp2', 'mlp3', 'mlp4'):
        mp = params[name]
        flat += [mp['w1'], mp['b1'], mp['w2'], mp['b2'], mp['g'], mp['b']]
    flat += [params['w_out'], params['b_out']]

    kern = functools.partial(_mlp_encoder_kernel, n_atoms=float(N), eps=eps)
    out = pl.pallas_call(
        kern,
        out_shape=jax.ShapeDtypeStruct((B * E, n_out), jnp.float32),
        in_specs=[_VMEM] * len(flat),
        out_specs=_VMEM,
    )(*flat)
    return out.reshape(B, E, n_out)


# --------------------------------------------------------------------------- params

def init_params(key, n_in, n_hid, n_out):
    """Synthetic init matching PyTorch distributions (xavier_uniform_, bias=0.1, BN 1/0)."""
    keys = jax.random.split(key, 5)

    def xavier(k, din, dout):
        a = math.sqrt(6.0 / (din + dout))
        return jax.random.uniform(k, (din, dout), jnp.float32, -a, a)

    def mlp_p(k, din, dhid, dout):
        k1, k2 = jax.random.split(k)
        return dict(w1=xavier(k1, din, dhid), b1=jnp.full((1, dhid), 0.1, jnp.float32),
                    w2=xavier(k2, dhid, dout), b2=jnp.full((1, dout), 0.1, jnp.float32),
                    g=jnp.ones((1, dout), jnp.float32), b=jnp.zeros((1, dout), jnp.float32))

    return dict(
        mlp1=mlp_p(keys[0], n_in, n_hid, n_hid),
        mlp2=mlp_p(keys[1], 2 * n_hid, n_hid, n_hid),
        mlp3=mlp_p(keys[2], n_hid, n_hid, n_hid),
        mlp4=mlp_p(keys[3], 3 * n_hid, n_hid, n_hid),
        w_out=xavier(keys[4], n_hid, n_out),
        b_out=jnp.full((1, n_out), 0.1, jnp.float32),
    )


# --------------------------------------------------------------------------- pure-JAX reference

def _reference_forward(inputs, rel_rec, rel_send, p, eps=_EPS):
    B, N, T, D = inputs.shape
    E = rel_rec.shape[0]
    dot = functools.partial(jnp.dot, precision=lax.Precision.HIGHEST)

    def mlp(x, mp):
        h = _elu(dot(x, mp['w1']) + mp['b1'])
        h = _elu(dot(h, mp['w2']) + mp['b2'])
        mean = jnp.mean(h, axis=0, keepdims=True)
        var = jnp.mean((h - mean) ** 2, axis=0, keepdims=True)
        return (h - mean) * lax.rsqrt(var + eps) * mp['g'] + mp['b']

    rr = jnp.kron(jnp.eye(B, dtype=jnp.float32), rel_rec.astype(jnp.float32))
    rs = jnp.kron(jnp.eye(B, dtype=jnp.float32), rel_send.astype(jnp.float32))
    x = inputs.reshape(B * N, T * D).astype(jnp.float32)
    x = mlp(x, p['mlp1'])
    x = mlp(jnp.concatenate([dot(rs, x), dot(rr, x)], -1), p['mlp2'])
    x_skip = x
    nodes = mlp(dot(rr.T, x) / N, p['mlp3'])
    x = jnp.concatenate([dot(rs, nodes), dot(rr, nodes), x_skip], -1)
    x = mlp(x, p['mlp4'])
    out = dot(x, p['w_out']) + p['b_out']
    return out.reshape(B, E, p['w_out'].shape[-1])


# --------------------------------------------------------------------------- main

if __name__ == "__main__":
    import numpy as np

    B, N, T, D = 2, 4, 16, 4          # batch, atoms, timesteps, dims
    n_in = T * D                      # MLPEncoder n_in = num_timesteps * num_dims
    n_hid, n_out = 32, 8
    E = N * (N - 1)

    key = jax.random.PRNGKey(0)
    k_in, k_par = jax.random.split(key)
    inputs = jax.random.normal(k_in, (B, N, T, D), jnp.float32)

    # Fully-connected (no self-loop) relation matrices, standard NRI convention.
    off_diag = np.ones((N, N)) - np.eye(N)
    recv_idx, send_idx = np.where(off_diag)
    rel_rec = jnp.asarray(np.eye(N)[recv_idx], jnp.float32)    # [E, N]
    rel_send = jnp.asarray(np.eye(N)[send_idx], jnp.float32)   # [E, N]

    params = init_params(k_par, n_in, n_hid, n_out)

    out = jax.jit(mlp_encoder)(inputs, rel_rec, rel_send, params)
    out = jax.block_until_ready(out)
    assert out.shape == (B, E, n_out), out.shape
    assert bool(jnp.all(jnp.isfinite(out)))

    ref = _reference_forward(inputs, rel_rec, rel_send, params)
    err = float(jnp.max(jnp.abs(out - ref)))
    assert err < 5e-2, f"max abs err vs pure-JAX reference = {err}"
    print("KERNEL_OK")
</pallas_src>

<mosaic_0001>
module attributes {stable_mosaic.version = 11 : i64} {
  func.func @_mlp_encoder_kernel(%arg0: memref<8x64xf32, #tpu.memory_space<vmem>>, %arg1: memref<24x8xf32, #tpu.memory_space<vmem>>, %arg2: memref<24x8xf32, #tpu.memory_space<vmem>>, %arg3: memref<8x24xf32, #tpu.memory_space<vmem>>, %arg4: memref<64x32xf32, #tpu.memory_space<vmem>>, %arg5: memref<1x32xf32, #tpu.memory_space<vmem>>, %arg6: memref<32x32xf32, #tpu.memory_space<vmem>>, %arg7: memref<1x32xf32, #tpu.memory_space<vmem>>, %arg8: memref<1x32xf32, #tpu.memory_space<vmem>>, %arg9: memref<1x32xf32, #tpu.memory_space<vmem>>, %arg10: memref<64x32xf32, #tpu.memory_space<vmem>>, %arg11: memref<1x32xf32, #tpu.memory_space<vmem>>, %arg12: memref<32x32xf32, #tpu.memory_space<vmem>>, %arg13: memref<1x32xf32, #tpu.memory_space<vmem>>, %arg14: memref<1x32xf32, #tpu.memory_space<vmem>>, %arg15: memref<1x32xf32, #tpu.memory_space<vmem>>, %arg16: memref<32x32xf32, #tpu.memory_space<vmem>>, %arg17: memref<1x32xf32, #tpu.memory_space<vmem>>, %arg18: memref<32x32xf32, #tpu.memory_space<vmem>>, %arg19: memref<1x32xf32, #tpu.memory_space<vmem>>, %arg20: memref<1x32xf32, #tpu.memory_space<vmem>>, %arg21: memref<1x32xf32, #tpu.memory_space<vmem>>, %arg22: memref<96x32xf32, #tpu.memory_space<vmem>>, %arg23: memref<1x32xf32, #tpu.memory_space<vmem>>, %arg24: memref<32x32xf32, #tpu.memory_space<vmem>>, %arg25: memref<1x32xf32, #tpu.memory_space<vmem>>, %arg26: memref<1x32xf32, #tpu.memory_space<vmem>>, %arg27: memref<1x32xf32, #tpu.memory_space<vmem>>, %arg28: memref<32x8xf32, #tpu.memory_space<vmem>>, %arg29: memref<1x8xf32, #tpu.memory_space<vmem>>, %arg30: memref<24x8xf32, #tpu.memory_space<vmem>>) attributes {dimension_semantics = [], scalar_prefetch = 0 : i64, scratch_operands = 0 : i64, tpu.core_type = #tpu.core_type<tc>} {
    %c0 = arith.constant 0 : index
    %c0_0 = arith.constant 0 : index
    %0 = vector.load %arg1[%c0, %c0_0] : memref<24x8xf32, #tpu.memory_space<vmem>>, vector<24x8xf32>
    %c0_1 = arith.constant 0 : index
    %c0_2 = arith.constant 0 : index
    %1 = vector.load %arg2[%c0_1, %c0_2] : memref<24x8xf32, #tpu.memory_space<vmem>>, vector<24x8xf32>
    %c0_3 = arith.constant 0 : index
    %c0_4 = arith.constant 0 : index
    %2 = vector.load %arg3[%c0_3, %c0_4] : memref<8x24xf32, #tpu.memory_space<vmem>>, vector<8x24xf32>
    %c0_5 = arith.constant 0 : index
    %c0_6 = arith.constant 0 : index
    %3 = vector.load %arg0[%c0_5, %c0_6] : memref<8x64xf32, #tpu.memory_space<vmem>>, vector<8x64xf32>
    %c0_7 = arith.constant 0 : index
    %c0_8 = arith.constant 0 : index
    %4 = vector.load %arg4[%c0_7, %c0_8] : memref<64x32xf32, #tpu.memory_space<vmem>>, vector<64x32xf32>
    %cst = arith.constant dense<0.000000e+00> : vector<8x32xf32>
    %5 = tpu.matmul %3, %4, %cst {dimension_numbers = #tpu.dot_dimension_numbers<[1], [0], [0], [1], [0, 0, 1, 1], [], []>} : vector<8x64xf32>, vector<64x32xf32>, vector<8x32xf32> -> vector<8x32xf32>
    %c0_9 = arith.constant 0 : index
    %c0_10 = arith.constant 0 : index
    %6 = vector.load %arg5[%c0_9, %c0_10] : memref<1x32xf32, #tpu.memory_space<vmem>>, vector<1x32xf32>
    %7 = vector.broadcast %6 : vector<1x32xf32> to vector<8x32xf32>
    %8 = arith.addf %5, %7 : vector<8x32xf32>
    %cst_11 = arith.constant 0.000000e+00 : f32
    %9 = vector.broadcast %cst_11 : f32 to vector<8x32xf32>
    %10 = arith.cmpf ogt, %8, %9 : vector<8x32xf32>
    %cst_12 = arith.constant 0.000000e+00 : f32
    %11 = vector.broadcast %cst_12 : f32 to vector<8x32xf32>
    %12 = arith.minimumf %8, %11 : vector<8x32xf32>
    %13 = math.exp %12 : vector<8x32xf32>
    %cst_13 = arith.constant 1.000000e+00 : f32
    %14 = vector.broadcast %cst_13 : f32 to vector<8x32xf32>
    %15 = arith.subf %13, %14 : vector<8x32xf32>
    %16 = arith.select %10, %8, %15 : vector<8x32xi1>, vector<8x32xf32>
    %c0_14 = arith.constant 0 : index
    %c0_15 = arith.constant 0 : index
    %17 = vector.load %arg6[%c0_14, %c0_15] : memref<32x32xf32, #tpu.memory_space<vmem>>, vector<32x32xf32>
    %cst_16 = arith.constant dense<0.000000e+00> : vector<8x32xf32>
    %18 = tpu.matmul %16, %17, %cst_16 {dimension_numbers = #tpu.dot_dimension_numbers<[1], [0], [0], [1], [0, 0, 1, 1], [], []>} : vector<8x32xf32>, vector<32x32xf32>, vector<8x32xf32> -> vector<8x32xf32>
    %c0_17 = arith.constant 0 : index
    %c0_18 = arith.constant 0 : index
    %19 = vector.load %arg7[%c0_17, %c0_18] : memref<1x32xf32, #tpu.memory_space<vmem>>, vector<1x32xf32>
    %20 = vector.broadcast %19 : vector<1x32xf32> to vector<8x32xf32>
    %21 = arith.addf %18, %20 : vector<8x32xf32>
    %cst_19 = arith.constant 0.000000e+00 : f32
    %22 = vector.broadcast %cst_19 : f32 to vector<8x32xf32>
    %23 = arith.cmpf ogt, %21, %22 : vector<8x32xf32>
    %cst_20 = arith.constant 0.000000e+00 : f32
    %24 = vector.broadcast %cst_20 : f32 to vector<8x32xf32>
    %25 = arith.minimumf %21, %24 : vector<8x32xf32>
    %26 = math.exp %25 : vector<8x32xf32>
    %cst_21 = arith.constant 1.000000e+00 : f32
    %27 = vector.broadcast %cst_21 : f32 to vector<8x32xf32>
    %28 = arith.subf %26, %27 : vector<8x32xf32>
    %29 = arith.select %23, %21, %28 : vector<8x32xi1>, vector<8x32xf32>
    %cst_22 = arith.constant dense<0.000000e+00> : vector<32xf32>
    %30 = vector.multi_reduction <add>, %29, %cst_22 [0] : vector<8x32xf32> to vector<32xf32>
    %31 = vector.shape_cast %30 : vector<32xf32> to vector<1x32xf32>
    %cst_23 = arith.constant 8.000000e+00 : f32
    %32 = vector.broadcast %cst_23 : f32 to vector<1x32xf32>
    %33 = arith.divf %31, %32 : vector<1x32xf32>
    %34 = vector.broadcast %33 : vector<1x32xf32> to vector<8x32xf32>
    %35 = arith.subf %29, %34 : vector<8x32xf32>
    %36 = arith.mulf %35, %35 : vector<8x32xf32>
    %cst_24 = arith.constant dense<0.000000e+00> : vector<32xf32>
    %37 = vector.multi_reduction <add>, %36, %cst_24 [0] : vector<8x32xf32> to vector<32xf32>
    %38 = vector.shape_cast %37 : vector<32xf32> to vector<1x32xf32>
    %cst_25 = arith.constant 8.000000e+00 : f32
    %39 = vector.broadcast %cst_25 : f32 to vector<1x32xf32>
    %40 = arith.divf %38, %39 : vector<1x32xf32>
    %41 = vector.broadcast %33 : vector<1x32xf32> to vector<8x32xf32>
    %42 = arith.subf %29, %41 : vector<8x32xf32>
    %cst_26 = arith.constant 9.99999974E-6 : f32
    %43 = vector.broadcast %cst_26 : f32 to vector<1x32xf32>
    %44 = arith.addf %40, %43 : vector<1x32xf32>
    %45 = math.rsqrt %44 : vector<1x32xf32>
    %46 = vector.broadcast %45 : vector<1x32xf32> to vector<8x32xf32>
    %47 = arith.mulf %42, %46 : vector<8x32xf32>
    %c0_27 = arith.constant 0 : index
    %c0_28 = arith.constant 0 : index
    %48 = vector.load %arg8[%c0_27, %c0_28] : memref<1x32xf32, #tpu.memory_space<vmem>>, vector<1x32xf32>
    %49 = vector.broadcast %48 : vector<1x32xf32> to vector<8x32xf32>
    %50 = arith.mulf %47, %49 : vector<8x32xf32>
    %c0_29 = arith.constant 0 : index
    %c0_30 = arith.constant 0 : index
    %51 = vector.load %arg9[%c0_29, %c0_30] : memref<1x32xf32, #tpu.memory_space<vmem>>, vector<1x32xf32>
    %52 = vector.broadcast %51 : vector<1x32xf32> to vector<8x32xf32>
    %53 = arith.addf %50, %52 : vector<8x32xf32>
    %cst_31 = arith.constant dense<0.000000e+00> : vector<24x32xf32>
    %54 = tpu.matmul %1, %53, %cst_31 {dimension_numbers = #tpu.dot_dimension_numbers<[1], [0], [0], [1], [0, 0, 1, 1], [], []>} : vector<24x8xf32>, vector<8x32xf32>, vector<24x32xf32> -> vector<24x32xf32>
    %cst_32 = arith.constant dense<0.000000e+00> : vector<24x32xf32>
    %55 = tpu.matmul %0, %53, %cst_32 {dimension_numbers = #tpu.dot_dimension_numbers<[1], [0], [0], [1], [0, 0, 1, 1], [], []>} : vector<24x8xf32>, vector<8x32xf32>, vector<24x32xf32> -> vector<24x32xf32>
    %56 = tpu.concatenate %54, %55 in 1 : vector<24x32xf32>, vector<24x32xf32> -> vector<24x64xf32>
    %c0_33 = arith.constant 0 : index
    %c0_34 = arith.constant 0 : index
    %57 = vector.load %arg10[%c0_33, %c0_34] : memref<64x32xf32, #tpu.memory_space<vmem>>, vector<64x32xf32>
    %cst_35 = arith.constant dense<0.000000e+00> : vector<24x32xf32>
    %58 = tpu.matmul %56, %57, %cst_35 {dimension_numbers = #tpu.dot_dimension_numbers<[1], [0], [0], [1], [0, 0, 1, 1], [], []>} : vector<24x64xf32>, vector<64x32xf32>, vector<24x32xf32> -> vector<24x32xf32>
    %c0_36 = arith.constant 0 : index
    %c0_37 = arith.constant 0 : index
    %59 = vector.load %arg11[%c0_36, %c0_37] : memref<1x32xf32, #tpu.memory_space<vmem>>, vector<1x32xf32>
    %60 = vector.broadcast %59 : vector<1x32xf32> to vector<24x32xf32>
    %61 = arith.addf %58, %60 : vector<24x32xf32>
    %cst_38 = arith.constant 0.000000e+00 : f32
    %62 = vector.broadcast %cst_38 : f32 to vector<24x32xf32>
    %63 = arith.cmpf ogt, %61, %62 : vector<24x32xf32>
    %cst_39 = arith.constant 0.000000e+00 : f32
    %64 = vector.broadcast %cst_39 : f32 to vector<24x32xf32>
    %65 = arith.minimumf %61, %64 : vector<24x32xf32>
    %66 = math.exp %65 : vector<24x32xf32>
    %cst_40 = arith.constant 1.000000e+00 : f32
    %67 = vector.broadcast %cst_40 : f32 to vector<24x32xf32>
    %68 = arith.subf %66, %67 : vector<24x32xf32>
    %69 = arith.select %63, %61, %68 : vector<24x32xi1>, vector<24x32xf32>
    %c0_41 = arith.constant 0 : index
    %c0_42 = arith.constant 0 : index
    %70 = vector.load %arg12[%c0_41, %c0_42] : memref<32x32xf32, #tpu.memory_space<vmem>>, vector<32x32xf32>
    %cst_43 = arith.constant dense<0.000000e+00> : vector<24x32xf32>
    %71 = tpu.matmul %69, %70, %cst_43 {dimension_numbers = #tpu.dot_dimension_numbers<[1], [0], [0], [1], [0, 0, 1, 1], [], []>} : vector<24x32xf32>, vector<32x32xf32>, vector<24x32xf32> -> vector<24x32xf32>
    %c0_44 = arith.constant 0 : index
    %c0_45 = arith.constant 0 : index
    %72 = vector.load %arg13[%c0_44, %c0_45] : memref<1x32xf32, #tpu.memory_space<vmem>>, vector<1x32xf32>
    %73 = vector.broadcast %72 : vector<1x32xf32> to vector<24x32xf32>
    %74 = arith.addf %71, %73 : vector<24x32xf32>
    %cst_46 = arith.constant 0.000000e+00 : f32
    %75 = vector.broadcast %cst_46 : f32 to vector<24x32xf32>
    %76 = arith.cmpf ogt, %74, %75 : vector<24x32xf32>
    %cst_47 = arith.constant 0.000000e+00 : f32
    %77 = vector.broadcast %cst_47 : f32 to vector<24x32xf32>
    %78 = arith.minimumf %74, %77 : vector<24x32xf32>
    %79 = math.exp %78 : vector<24x32xf32>
    %cst_48 = arith.constant 1.000000e+00 : f32
    %80 = vector.broadcast %cst_48 : f32 to vector<24x32xf32>
    %81 = arith.subf %79, %80 : vector<24x32xf32>
    %82 = arith.select %76, %74, %81 : vector<24x32xi1>, vector<24x32xf32>
    %cst_49 = arith.constant dense<0.000000e+00> : vector<32xf32>
    %83 = vector.multi_reduction <add>, %82, %cst_49 [0] : vector<24x32xf32> to vector<32xf32>
    %84 = vector.shape_cast %83 : vector<32xf32> to vector<1x32xf32>
    %cst_50 = arith.constant 2.400000e+01 : f32
    %85 = vector.broadcast %cst_50 : f32 to vector<1x32xf32>
    %86 = arith.divf %84, %85 : vector<1x32xf32>
    %87 = vector.broadcast %86 : vector<1x32xf32> to vector<24x32xf32>
    %88 = arith.subf %82, %87 : vector<24x32xf32>
    %89 = arith.mulf %88, %88 : vector<24x32xf32>
    %cst_51 = arith.constant dense<0.000000e+00> : vector<32xf32>
    %90 = vector.multi_reduction <add>, %89, %cst_51 [0] : vector<24x32xf32> to vector<32xf32>
    %91 = vector.shape_cast %90 : vector<32xf32> to vector<1x32xf32>
    %cst_52 = arith.constant 2.400000e+01 : f32
    %92 = vector.broadcast %cst_52 : f32 to vector<1x32xf32>
    %93 = arith.divf %91, %92 : vector<1x32xf32>
    %94 = vector.broadcast %86 : vector<1x32xf32> to vector<24x32xf32>
    %95 = arith.subf %82, %94 : vector<24x32xf32>
    %cst_53 = arith.constant 9.99999974E-6 : f32
    %96 = vector.broadcast %cst_53 : f32 to vector<1x32xf32>
    %97 = arith.addf %93, %96 : vector<1x32xf32>
    %98 = math.rsqrt %97 : vector<1x32xf32>
    %99 = vector.broadcast %98 : vector<1x32xf32> to vector<24x32xf32>
    %100 = arith.mulf %95, %99 : vector<24x32xf32>
    %c0_54 = arith.constant 0 : index
    %c0_55 = arith.constant 0 : index
    %101 = vector.load %arg14[%c0_54, %c0_55] : memref<1x32xf32, #tpu.memory_space<vmem>>, vector<1x32xf32>
    %102 = vector.broadcast %101 : vector<1x32xf32> to vector<24x32xf32>
    %103 = arith.mulf %100, %102 : vector<24x32xf32>
    %c0_56 = arith.constant 0 : index
    %c0_57 = arith.constant 0 : index
    %104 = vector.load %arg15[%c0_56, %c0_57] : memref<1x32xf32, #tpu.memory_space<vmem>>, vector<1x32xf32>
    %105 = vector.broadcast %104 : vector<1x32xf32> to vector<24x32xf32>
    %106 = arith.addf %103, %105 : vector<24x32xf32>
    %cst_58 = arith.constant dense<0.000000e+00> : vector<8x32xf32>
    %107 = tpu.matmul %2, %106, %cst_58 {dimension_numbers = #tpu.dot_dimension_numbers<[1], [0], [0], [1], [0, 0, 1, 1], [], []>} : vector<8x24xf32>, vector<24x32xf32>, vector<8x32xf32> -> vector<8x32xf32>
    %cst_59 = arith.constant 2.500000e-01 : f32
    %108 = vector.broadcast %cst_59 : f32 to vector<8x32xf32>
    %109 = arith.mulf %107, %108 : vector<8x32xf32>
    %c0_60 = arith.constant 0 : index
    %c0_61 = arith.constant 0 : index
    %110 = vector.load %arg16[%c0_60, %c0_61] : memref<32x32xf32, #tpu.memory_space<vmem>>, vector<32x32xf32>
    %cst_62 = arith.constant dense<0.000000e+00> : vector<8x32xf32>
    %111 = tpu.matmul %109, %110, %cst_62 {dimension_numbers = #tpu.dot_dimension_numbers<[1], [0], [0], [1], [0, 0, 1, 1], [], []>} : vector<8x32xf32>, vector<32x32xf32>, vector<8x32xf32> -> vector<8x32xf32>
    %c0_63 = arith.constant 0 : index
    %c0_64 = arith.constant 0 : index
    %112 = vector.load %arg17[%c0_63, %c0_64] : memref<1x32xf32, #tpu.memory_space<vmem>>, vector<1x32xf32>
    %113 = vector.broadcast %112 : vector<1x32xf32> to vector<8x32xf32>
    %114 = arith.addf %111, %113 : vector<8x32xf32>
    %cst_65 = arith.constant 0.000000e+00 : f32
    %115 = vector.broadcast %cst_65 : f32 to vector<8x32xf32>
    %116 = arith.cmpf ogt, %114, %115 : vector<8x32xf32>
    %cst_66 = arith.constant 0.000000e+00 : f32
    %117 = vector.broadcast %cst_66 : f32 to vector<8x32xf32>
    %118 = arith.minimumf %114, %117 : vector<8x32xf32>
    %119 = math.exp %118 : vector<8x32xf32>
    %cst_67 = arith.constant 1.000000e+00 : f32
    %120 = vector.broadcast %cst_67 : f32 to vector<8x32xf32>
    %121 = arith.subf %119, %120 : vector<8x32xf32>
    %122 = arith.select %116, %114, %121 : vector<8x32xi1>, vector<8x32xf32>
    %c0_68 = arith.constant 0 : index
    %c0_69 = arith.constant 0 : index
    %123 = vector.load %arg18[%c0_68, %c0_69] : memref<32x32xf32, #tpu.memory_space<vmem>>, vector<32x32xf32>
    %cst_70 = arith.constant dense<0.000000e+00> : vector<8x32xf32>
    %124 = tpu.matmul %122, %123, %cst_70 {dimension_numbers = #tpu.dot_dimension_numbers<[1], [0], [0], [1], [0, 0, 1, 1], [], []>} : vector<8x32xf32>, vector<32x32xf32>, vector<8x32xf32> -> vector<8x32xf32>
    %c0_71 = arith.constant 0 : index
    %c0_72 = arith.constant 0 : index
    %125 = vector.load %arg19[%c0_71, %c0_72] : memref<1x32xf32, #tpu.memory_space<vmem>>, vector<1x32xf32>
    %126 = vector.broadcast %125 : vector<1x32xf32> to vector<8x32xf32>
    %127 = arith.addf %124, %126 : vector<8x32xf32>
    %cst_73 = arith.constant 0.000000e+00 : f32
    %128 = vector.broadcast %cst_73 : f32 to vector<8x32xf32>
    %129 = arith.cmpf ogt, %127, %128 : vector<8x32xf32>
    %cst_74 = arith.constant 0.000000e+00 : f32
    %130 = vector.broadcast %cst_74 : f32 to vector<8x32xf32>
    %131 = arith.minimumf %127, %130 : vector<8x32xf32>
    %132 = math.exp %131 : vector<8x32xf32>
    %cst_75 = arith.constant 1.000000e+00 : f32
    %133 = vector.broadcast %cst_75 : f32 to vector<8x32xf32>
    %134 = arith.subf %132, %133 : vector<8x32xf32>
    %135 = arith.select %129, %127, %134 : vector<8x32xi1>, vector<8x32xf32>
    %cst_76 = arith.constant dense<0.000000e+00> : vector<32xf32>
    %136 = vector.multi_reduction <add>, %135, %cst_76 [0] : vector<8x32xf32> to vector<32xf32>
    %137 = vector.shape_cast %136 : vector<32xf32> to vector<1x32xf32>
    %cst_77 = arith.constant 8.000000e+00 : f32
    %138 = vector.broadcast %cst_77 : f32 to vector<1x32xf32>
    %139 = arith.divf %137, %138 : vector<1x32xf32>
    %140 = vector.broadcast %139 : vector<1x32xf32> to vector<8x32xf32>
    %141 = arith.subf %135, %140 : vector<8x32xf32>
    %142 = arith.mulf %141, %141 : vector<8x32xf32>
    %cst_78 = arith.constant dense<0.000000e+00> : vector<32xf32>
    %143 = vector.multi_reduction <add>, %142, %cst_78 [0] : vector<8x32xf32> to vector<32xf32>
    %144 = vector.shape_cast %143 : vector<32xf32> to vector<1x32xf32>
    %cst_79 = arith.constant 8.000000e+00 : f32
    %145 = vector.broadcast %cst_79 : f32 to vector<1x32xf32>
    %146 = arith.divf %144, %145 : vector<1x32xf32>
    %147 = vector.broadcast %139 : vector<1x32xf32> to vector<8x32xf32>
    %148 = arith.subf %135, %147 : vector<8x32xf32>
    %cst_80 = arith.constant 9.99999974E-6 : f32
    %149 = vector.broadcast %cst_80 : f32 to vector<1x32xf32>
    %150 = arith.addf %146, %149 : vector<1x32xf32>
    %151 = math.rsqrt %150 : vector<1x32xf32>
    %152 = vector.broadcast %151 : vector<1x32xf32> to vector<8x32xf32>
    %153 = arith.mulf %148, %152 : vector<8x32xf32>
    %c0_81 = arith.constant 0 : index
    %c0_82 = arith.constant 0 : index
    %154 = vector.load %arg20[%c0_81, %c0_82] : memref<1x32xf32, #tpu.memory_space<vmem>>, vector<1x32xf32>
    %155 = vector.broadcast %154 : vector<1x32xf32> to vector<8x32xf32>
    %156 = arith.mulf %153, %155 : vector<8x32xf32>
    %c0_83 = arith.constant 0 : index
    %c0_84 = arith.constant 0 : index
    %157 = vector.load %arg21[%c0_83, %c0_84] : memref<1x32xf32, #tpu.memory_space<vmem>>, vector<1x32xf32>
    %158 = vector.broadcast %157 : vector<1x32xf32> to vector<8x32xf32>
    %159 = arith.addf %156, %158 : vector<8x32xf32>
    %cst_85 = arith.constant dense<0.000000e+00> : vector<24x32xf32>
    %160 = tpu.matmul %1, %159, %cst_85 {dimension_numbers = #tpu.dot_dimension_numbers<[1], [0], [0], [1], [0, 0, 1, 1], [], []>} : vector<24x8xf32>, vector<8x32xf32>, vector<24x32xf32> -> vector<24x32xf32>
    %cst_86 = arith.constant dense<0.000000e+00> : vector<24x32xf32>
    %161 = tpu.matmul %0, %159, %cst_86 {dimension_numbers = #tpu.dot_dimension_numbers<[1], [0], [0], [1], [0, 0, 1, 1], [], []>} : vector<24x8xf32>, vector<8x32xf32>, vector<24x32xf32> -> vector<24x32xf32>
    %162 = tpu.concatenate %160, %161, %106 in 1 : vector<24x32xf32>, vector<24x32xf32>, vector<24x32xf32> -> vector<24x96xf32>
    %c0_87 = arith.constant 0 : index
    %c0_88 = arith.constant 0 : index
    %163 = vector.load %arg22[%c0_87, %c0_88] : memref<96x32xf32, #tpu.memory_space<vmem>>, vector<96x32xf32>
    %cst_89 = arith.constant dense<0.000000e+00> : vector<24x32xf32>
    %164 = tpu.matmul %162, %163, %cst_89 {dimension_numbers = #tpu.dot_dimension_numbers<[1], [0], [0], [1], [0, 0, 1, 1], [], []>} : vector<24x96xf32>, vector<96x32xf32>, vector<24x32xf32> -> vector<24x32xf32>
    %c0_90 = arith.constant 0 : index
    %c0_91 = arith.constant 0 : index
    %165 = vector.load %arg23[%c0_90, %c0_91] : memref<1x32xf32, #tpu.memory_space<vmem>>, vector<1x32xf32>
    %166 = vector.broadcast %165 : vector<1x32xf32> to vector<24x32xf32>
    %167 = arith.addf %164, %166 : vector<24x32xf32>
    %cst_92 = arith.constant 0.000000e+00 : f32
    %168 = vector.broadcast %cst_92 : f32 to vector<24x32xf32>
    %169 = arith.cmpf ogt, %167, %168 : vector<24x32xf32>
    %cst_93 = arith.constant 0.000000e+00 : f32
    %170 = vector.broadcast %cst_93 : f32 to vector<24x32xf32>
    %171 = arith.minimumf %167, %170 : vector<24x32xf32>
    %172 = math.exp %171 : vector<24x32xf32>
    %cst_94 = arith.constant 1.000000e+00 : f32
    %173 = vector.broadcast %cst_94 : f32 to vector<24x32xf32>
    %174 = arith.subf %172, %173 : vector<24x32xf32>
    %175 = arith.select %169, %167, %174 : vector<24x32xi1>, vector<24x32xf32>
    %c0_95 = arith.constant 0 : index
    %c0_96 = arith.constant 0 : index
    %176 = vector.load %arg24[%c0_95, %c0_96] : memref<32x32xf32, #tpu.memory_space<vmem>>, vector<32x32xf32>
    %cst_97 = arith.constant dense<0.000000e+00> : vector<24x32xf32>
    %177 = tpu.matmul %175, %176, %cst_97 {dimension_numbers = #tpu.dot_dimension_numbers<[1], [0], [0], [1], [0, 0, 1, 1], [], []>} : vector<24x32xf32>, vector<32x32xf32>, vector<24x32xf32> -> vector<24x32xf32>
    %c0_98 = arith.constant 0 : index
    %c0_99 = arith.constant 0 : index
    %178 = vector.load %arg25[%c0_98, %c0_99] : memref<1x32xf32, #tpu.memory_space<vmem>>, vector<1x32xf32>
    %179 = vector.broadcast %178 : vector<1x32xf32> to vector<24x32xf32>
    %180 = arith.addf %177, %179 : vector<24x32xf32>
    %cst_100 = arith.constant 0.000000e+00 : f32
    %181 = vector.broadcast %cst_100 : f32 to vector<24x32xf32>
    %182 = arith.cmpf ogt, %180, %181 : vector<24x32xf32>
    %cst_101 = arith.constant 0.000000e+00 : f32
    %183 = vector.broadcast %cst_101 : f32 to vector<24x32xf32>
    %184 = arith.minimumf %180, %183 : vector<24x32xf32>
    %185 = math.exp %184 : vector<24x32xf32>
    %cst_102 = arith.constant 1.000000e+00 : f32
    %186 = vector.broadcast %cst_102 : f32 to vector<24x32xf32>
    %187 = arith.subf %185, %186 : vector<24x32xf32>
    %188 = arith.select %182, %180, %187 : vector<24x32xi1>, vector<24x32xf32>
    %cst_103 = arith.constant dense<0.000000e+00> : vector<32xf32>
    %189 = vector.multi_reduction <add>, %188, %cst_103 [0] : vector<24x32xf32> to vector<32xf32>
    %190 = vector.shape_cast %189 : vector<32xf32> to vector<1x32xf32>
    %cst_104 = arith.constant 2.400000e+01 : f32
    %191 = vector.broadcast %cst_104 : f32 to vector<1x32xf32>
    %192 = arith.divf %190, %191 : vector<1x32xf32>
    %193 = vector.broadcast %192 : vector<1x32xf32> to vector<24x32xf32>
    %194 = arith.subf %188, %193 : vector<24x32xf32>
    %195 = arith.mulf %194, %194 : vector<24x32xf32>
    %cst_105 = arith.constant dense<0.000000e+00> : vector<32xf32>
    %196 = vector.multi_reduction <add>, %195, %cst_105 [0] : vector<24x32xf32> to vector<32xf32>
    %197 = vector.shape_cast %196 : vector<32xf32> to vector<1x32xf32>
    %cst_106 = arith.constant 2.400000e+01 : f32
    %198 = vector.broadcast %cst_106 : f32 to vector<1x32xf32>
    %199 = arith.divf %197, %198 : vector<1x32xf32>
    %200 = vector.broadcast %192 : vector<1x32xf32> to vector<24x32xf32>
    %201 = arith.subf %188, %200 : vector<24x32xf32>
    %cst_107 = arith.constant 9.99999974E-6 : f32
    %202 = vector.broadcast %cst_107 : f32 to vector<1x32xf32>
    %203 = arith.addf %199, %202 : vector<1x32xf32>
    %204 = math.rsqrt %203 : vector<1x32xf32>
    %205 = vector.broadcast %204 : vector<1x32xf32> to vector<24x32xf32>
    %206 = arith.mulf %201, %205 : vector<24x32xf32>
    %c0_108 = arith.constant 0 : index
    %c0_109 = arith.constant 0 : index
    %207 = vector.load %arg26[%c0_108, %c0_109] : memref<1x32xf32, #tpu.memory_space<vmem>>, vector<1x32xf32>
    %208 = vector.broadcast %207 : vector<1x32xf32> to vector<24x32xf32>
    %209 = arith.mulf %206, %208 : vector<24x32xf32>
    %c0_110 = arith.constant 0 : index
    %c0_111 = arith.constant 0 : index
    %210 = vector.load %arg27[%c0_110, %c0_111] : memref<1x32xf32, #tpu.memory_space<vmem>>, vector<1x32xf32>
    %211 = vector.broadcast %210 : vector<1x32xf32> to vector<24x32xf32>
    %212 = arith.addf %209, %211 : vector<24x32xf32>
    %c0_112 = arith.constant 0 : index
    %c0_113 = arith.constant 0 : index
    %213 = vector.load %arg28[%c0_112, %c0_113] : memref<32x8xf32, #tpu.memory_space<vmem>>, vector<32x8xf32>
    %cst_114 = arith.constant dense<0.000000e+00> : vector<24x8xf32>
    %214 = tpu.matmul %212, %213, %cst_114 {dimension_numbers = #tpu.dot_dimension_numbers<[1], [0], [0], [1], [0, 0, 1, 1], [], []>} : vector<24x32xf32>, vector<32x8xf32>, vector<24x8xf32> -> vector<24x8xf32>
    %c0_115 = arith.constant 0 : index
    %c0_116 = arith.constant 0 : index
    %215 = vector.load %arg29[%c0_115, %c0_116] : memref<1x8xf32, #tpu.memory_space<vmem>>, vector<1x8xf32>
    %216 = vector.broadcast %215 : vector<1x8xf32> to vector<24x8xf32>
    %217 = arith.addf %214, %216 : vector<24x8xf32>
    %c0_117 = arith.constant 0 : index
    %c0_118 = arith.constant 0 : index
    %218 = vector.load %arg30[%c0_117, %c0_118] : memref<24x8xf32, #tpu.memory_space<vmem>>, vector<24x8xf32>
    tpu.vector_store %arg30[%c0_117, %c0_118], %217 {strides = array<i32>} : memref<24x8xf32, #tpu.memory_space<vmem>>, vector<24x8xf32>,
    return
  }
}

</mosaic_0001>

<bundles_post_ra>
// kernel: mlp_encoder.1
= control target key start
LH: loop header
LB: loop body
LE: loop exit
PB: predicated region body
PF: predicated region fallthrough
CT: control target
= control target key end

     0   :  { %v2293_v0 = vmov 0.0|0.0   ;;  %s2294_s3 = smov 4   ;;  %vm2295_vm0 = vmmov 0   ;;  %v2296_v1 = vmov 0.0   ;;  %vm149_vm1 = vcmask 523264   ;;  %s2297_s10 = smov 6   ;;  %s2608_s0 = inlined_call_operand.smem [shape: u32[31], index: -1, kind: input, shape index: {}] }
   0x1   :  { %2137 = vmatprep.subr.bf16.mxu0 %v2293_v0  ;;  %s1740_s6 = sld [smem:[%s2608_s0 + %s2294_s3]]   ;;  %1939 = vmatprep.mubr.msk.f32.mxu0 %vm2295_vm0, %v2296_v1  ;;  %s2298_s14 = smov 5   ;;  %vm240_vm2 = vcmask 261120   ;;  %vm358_vm5 = vcmask 64512   ;;  %vm848_vm12 = vcmask 195584   ;;  %vm1349_vm15 = vcmask 785408  }
   0x2   :  { %2149 = vmatprep.subr.bf16.mxu1 %v2293_v0  ;;  %1950 = vmatprep.mubr.msk.f32.mxu1 %vm2295_vm0, %v2296_v1  ;;  %s1_s9 = sld [smem:[%s2608_s0]]   ;;  %s2299_s18 = smov 7  }
   0x3   :  { %s1742_s13 = sld [smem:[%s2608_s0 + %s2297_s10]]   ;;  %s2300_s22 = smov 8  }
   0x4   :  { %s1741_s17 = sld [smem:[%s2608_s0 + %s2298_s14]]   ;;  %s2301_s26 = smov 9  }
   0x5   :  { %s1743_s21 = sld [smem:[%s2608_s0 + %s2299_s18]]   ;;  %s2302_s30 = smov 1  }
   0x6   :  { %s1744_s25 = sld [smem:[%s2608_s0 + %s2300_s22]]   ;;  %s2303_s4 = smov 2  }
   0x7   :  { %v134_v2 = vld [vmem:[%s1740_s6] sm:$0xff]  ;;  %v135_v3 = vld [vmem:[%s1740_s6 + $0x8] sm:$0xff]  ;;  %v136_v4 = vld [vmem:[%s1740_s6 + $0x10] sm:$0xff]  ;;  %s1745_s29 = sld [smem:[%s2608_s0 + %s2301_s26]]   ;;  %s2304_s8 = smov 10  }
   0x8   :  { %v2138_v5 = vpack.c.bf16 %v135_v3, %v134_v2  ;;  %v137_v6 = vld [vmem:[%s1740_s6 + $0x18] sm:$0xff]  ;;  %v138_v8 = vld [vmem:[%s1740_s6 + $0x20] sm:$0xff]  ;;  %v139_v9 = vld [vmem:[%s1740_s6 + $0x28] sm:$0xff]  ;;  %s1737_s3 = sld [smem:[%s2608_s0 + %s2302_s30]]   ;;  %s2305_s12 = smov 32  }
   0x9   :  { %v2141_v7 = vpack.c.bf16 %v137_v6, %v136_v4  ;;  %v2144_v10 = vpack.c.bf16 %v139_v9, %v138_v8  ;;  %v140_v11 = vld [vmem:[%s1740_s6 + $0x30] sm:$0xff]  ;;  %v141_v12 = vld [vmem:[%s1740_s6 + $0x38] sm:$0xff]  ;;  %v133_v14 = vld [vmem:[%s1_s9] sm:$0xff]  ;;  %s1738_s7 = sld [smem:[%s2608_s0 + %s2303_s4]]   ;;  %s2322_s15 = smov 28  }
   0xa   :  { %2139 = vmatpush3.bf16.msra.mxu0 %v2138_v5  ;;  %v2147_v13 = vpack.c.bf16 %v141_v12, %v140_v11  ;;  %v229_v15 = vld [vmem:[%s1742_s13] sm:$0xff]  ;;  %v230_v16 = vld [vmem:[%s1742_s13 + $0x8] sm:$0xff]  ;;  %v231_v17 = vld [vmem:[%s1742_s13 + $0x10] sm:$0xff]  ;;  %s1746_s11 = sld [smem:[%s2608_s0 + %s2304_s8]]   ;;  %s2323_s19 = smov 25  }
   0xb   :  { %2140 = vmatprep.subr.bf16.mxu0 %v2293_v0  ;;  %v2150_v18 = vpack.c.bf16 %v230_v16, %v229_v15  ;;  %v232_v19 = vld [vmem:[%s1742_s13 + $0x18] sm:$0xff]  ;;  %v1767_v21 = vld [vmem:[%s1741_s17] ss:$0 sm:$0xff]  ;;  %s2306_s13 = smov 12   ;;  %s2307_s17 = smov 11  }
   0xc   :  { %v2153_v20 = vpack.c.bf16 %v232_v19, %v231_v17  ;;  %v1770_v30 = vld [vmem:[%s1743_s21] ss:$0 sm:$0xff]  ;;  %s1748_s16 = sld [smem:[%s2608_s0 + %s2306_s13]]   ;;  %s2308_s21 = smov 13  }
   0xd   :  { %2151 = vmatpush3.bf16.msra.mxu1 %v2150_v18  ;;  %v1773_v59 = vld [vmem:[%s1744_s25] ss:$0 sm:$0xff]  ;;  %s1747_s20 = sld [smem:[%s2608_s0 + %s2307_s17]]   ;;  %s2309_s25 = smov 14  }
   0xe   :  { %2142 = vmatpush3.bf16.msra.mxu0 %v2141_v7  ;;  %2152 = vmatprep.subr.bf16.mxu1 %v2293_v0  ;;  %v1774_v61 = vld [vmem:[%s1745_s29] ss:$0 sm:$0xff]  ;;  %v2390_v4 = vld [vmem:[%s1737_s3 + $0x8] sm:$0xff]  ;;  %v2404_v6 = vld [vmem:[%s1737_s3 + $0x10] sm:$0xff]  ;;  %s1749_s24 = sld [smem:[%s2608_s0 + %s2308_s21]]   ;;  %s2310_s29 = smov 15  }
   0xf   :  { %2143 = vmatprep.subr.bf16.mxu0 %v2293_v0  ;;  %v2380_v2 = vld [vmem:[%s1737_s3] sm:$0xff]  ;;  %v2394_v5 = vld [vmem:[%s1738_s7 + $0x8] sm:$0xff]  ;;  %v2408_v7 = vld [vmem:[%s1738_s7 + $0x10] sm:$0xff]  ;;  %s1750_s28 = sld [smem:[%s2608_s0 + %s2309_s25]]   ;;  %s2311_s3 = smov 16  }
  0x10   :  { %v2382_v3 = vld [vmem:[%s1738_s7] sm:$0xff]  ;;  %v553_v9 = vld [vmem:[%s1746_s11 + $0x8] sm:$0xff]  ;;  %v555_v12 = vld [vmem:[%s1746_s11 + $0x18] sm:$0xff]  ;;  %s1751_s2 = sld [smem:[%s2608_s0 + %s2310_s29]]   ;;  %s2312_s7 = smov 3  }
  0x11   :  { %2154 = vmatpush3.bf16.msra.mxu1 %v2153_v20  ;;  %v552_v8 = vld [vmem:[%s1746_s11] sm:$0xff]  ;;  %v557_v15 = vld [vmem:[%s1746_s11 + $0x28] sm:$0xff]  ;;  %v558_v17 = vld [vmem:[%s1746_s11 + $0x30] sm:$0xff]  ;;  %s1752_s6 = sld [smem:[%s2608_s0 + %s2311_s3]]   ;;  %s2314_s13 = smov 18  }
  0x12   :  { %2145 = vmatpush3.bf16.msra.mxu0 %v2144_v10  ;;  %1953 = vmatprep.subr.mxu1 %v2296_v1  ;;  %v554_v10 = vld [vmem:[%s1746_s11 + $0x10] sm:$0xff]  ;;  %v2156_v11 = vpack.c.bf16 %v553_v9, %v552_v8  ;;  %v559_v18 = vld [vmem:[%s1746_s11 + $0x38] sm:$0xff]  ;;  %s1739_s10 = sld [smem:[%s2608_s0 + %s2312_s7]]   ;;  %s2315_s17 = smov 17  }
  0x13   :  { %2146 = vmatprep.subr.bf16.mxu0 %v2293_v0  ;;  %v2165_v19 = vpack.c.bf16 %v559_v18, %v558_v17  ;;  %s2316_s21 = smov 19   ;;  %s2317_s25 = smov 20  }
  0x14   :  { %s2318_s29 = smov 21   ;;  %s2319_s3 = smov 22  }
  0x15   :  { %s1764_s18 = sld [smem:[%s2608_s0 + %s2322_s15]]   ;;  %s2324_s23 = smov 26  }
  0x16   :  { %2148 = vmatpush3.bf16.msra.mxu0 %v2147_v13  ;;  %v2159_v13 = vpack.c.bf16 %v555_v12, %v554_v10  ;;  %s1761_s22 = sld [smem:[%s2608_s0 + %s2323_s19]]   ;;  %s2325_s27 = smov 27  }
  0x17   :  { %1964 = vmatprep.subr.mxu0 %v2296_v1  ;;  %s1762_s26 = sld [smem:[%s2608_s0 + %s2324_s23]]   ;;  %s2326_s1 = smov 29  }
  0x18   :  { %s1763_s30 = sld [smem:[%s2608_s0 + %s2325_s27]]   ;;  %s2327_s5 = smov 30  }
  0x19   :  { %1940 = vmatmul.mubr.msk.f32.vlgmr.msra.gmra.mrb[0].mxu0 %vm149_vm1, %v133_v14  ;;  %v556_v14 = vld [vmem:[%s1746_s11 + $0x20] sm:$0xff]  ;;  %s2313_s11 = smov 64   ;;  %s1765_s4 = sld [smem:[%s2608_s0 + %s2326_s1]]  }
  0x1a   :  { %1966 = vmatprep.mubr.msk.f32.mxu0 %vm2295_vm0, %v2296_v1  ;;  %v2162_v16 = vpack.c.bf16 %v557_v15, %v556_v14  ;;  %s1766_s7 = sld [smem:[%s2608_s0 + %s2327_s5]]  }
  0xec   :  { %v219_v22 = vpop.f32.mrb[0].mxu0 }
  0xed   :  { %v220_v23 = vadd.f32 %v1767_v21, %v219_v22  ;;  %v1941_v24 = vpop.f32.mrb[1].mxu0 }
  0xef   :  { %v224_v25 = vmin.f32 %v220_v23, 0.0  ;;  %vm223_vm3 = vcmp.gt.f32.partialorder %v220_v23, 0.0 }
  0xf1   :  { %v225_v26 = vmul.f32 1.442695, %v224_v25 }
  0xf3   :  { %2253 = vpow2.f32 %v225_v26 }
  0xfd   :  { %v2254_v27 = vpop.eup %2253 }
  0xfe   :  { %v1769_v28 = vadd.f32 -1.0, %v2254_v27 }
 0x100   :  { %v228_v29 = vsel %vm223_vm3, %v220_v23, %v1769_v28 }
 0x101   :  { %1951 = vmatmul.mubr.msk.f32.vlgmr.msra.gmra.mrb[0].mxu1 %vm240_vm2, %v228_v29 }
 0x102   :  { %1955 = vmatprep.mubr.msk.f32.mxu1 %vm2295_vm0, %v2296_v1 }
 0x1d4   :  { %v310_v31 = vpop.f32.mrb[0].mxu1 }
 0x1d5   :  { %v311_v32 = vadd.f32 %v1770_v30, %v310_v31  ;;  %v1952_v33 = vpop.f32.mrb[1].mxu1 }
 0x1d7   :  { %v315_v34 = vmin.f32 %v311_v32, 0.0  ;;  %vm314_vm4 = vcmp.gt.f32.partialorder %v311_v32, 0.0 }
 0x1d9   :  { %v316_v35 = vmul.f32 1.442695, %v315_v34 }
 0x1db   :  { %2255 = vpow2.f32 %v316_v35 }
 0x1e5   :  { %v2256_v36 = vpop.eup %2255 }
 0x1e6   :  { %v1772_v37 = vadd.f32 -1.0, %v2256_v36 }
 0x1e8   :  { %v319_v38 = vsel %vm314_vm4, %v311_v32, %v1772_v37 }
 0x1e9   :  { %v320_v39 = vsel %vm240_vm2, %v319_v38, 0.0 }
 0x1ea   :  { %v321_v40 = vrot.slane %v320_v39, 4 }
 0x1ec   :  { %v322_v41 = vadd.f32 %v321_v40, %v320_v39  ;;  %v675_v39 = vld [vmem:[%s1748_s16 + $0x8] sm:$0xff] }
 0x1ee   :  { %v323_v42 = vrot.slane %v322_v41, 2 }
 0x1f0   :  { %v324_v43 = vadd.f32 %v323_v42, %v322_v41  ;;  %v676_v41 = vld [vmem:[%s1748_s16 + $0x10] sm:$0xff]  ;;  %v677_v42 = vld [vmem:[%s1748_s16 + $0x18] sm:$0xff] }
 0x1f2   :  { %v325_v44 = vrot.slane %v324_v43, 1 }
 0x1f4   :  { %v326_v45 = vadd.f32 %v325_v44, %v324_v43  ;;  %v2171_v43 = vpack.c.bf16 %v677_v42, %v676_v41  ;;  %v1781_v44 = vld [vmem:[%s1747_s20] ss:$0 sm:$0xff]  ;;  %s1753_s20 = sld [smem:[%s2608_s0 + %s2315_s17]]  }
 0x1f6   :  { %v328_v46 = vmul.f32 0.125, %v326_v45 }
 0x1f8   :  { %v329_v47 = vsub.f32 %v319_v38, %v328_v46  ;;  %v674_v38 = vld [vmem:[%s1748_s16] sm:$0xff]  ;;  %s1754_s16 = sld [smem:[%s2608_s0 + %s2314_s13]]  }
 0x1f9   :  { %v2168_v40 = vpack.c.bf16 %v675_v39, %v674_v38 }
 0x1fa   :  { %v330_v48 = vmul.f32 %v329_v47, %v329_v47 }
 0x1fc   :  { %v331_v49 = vsel %vm240_vm2, %v330_v48, 0.0 }
 0x1fd   :  { %v332_v50 = vrot.slane %v331_v49, 4 }
 0x1ff   :  { %v333_v51 = vadd.f32 %v332_v50, %v331_v49 }
 0x201   :  { %v334_v52 = vrot.slane %v333_v51, 2 }
 0x203   :  { %v335_v53 = vadd.f32 %v334_v52, %v333_v51 }
 0x205   :  { %v336_v54 = vrot.slane %v335_v53, 1 }
 0x207   :  { %v337_v55 = vadd.f32 %v336_v54, %v335_v53 }
 0x209   :  { %v338_v56 = vmul.f32 0.125, %v337_v55 }
 0x20b   :  { %v339_v57 = vadd.f32 1e-05, %v338_v56 }
 0x20d   :  { %2257 = vrsqrt.f32 %v339_v57 }
 0x217   :  { %v2258_v58 = vpop.eup %2257 }
 0x218   :  { %v341_v60 = vmul.f32 %v2258_v58, %v329_v47 }
 0x21a   :  { %v349_v62 = vmul.f32 %v1773_v59, %v341_v60 }
 0x21c   :  { %v357_v63 = vadd.f32 %v1774_v61, %v349_v62 }
 0x21e   :  { %1954 = vmatpush3.msra.mxu1 %v357_v63  ;;  %1965 = vmatpush3.msra.mxu0 %v357_v63 }
 0x21f   :  { %1967 = vmatmul.mubr.msk.f32.vlgmr.msra.gmra.mrb[2].mxu0 %vm358_vm5, %v2380_v2  ;;  %1956 = vmatmul.mubr.msk.f32.vlgmr.msra.gmra.mrb[2].mxu1 %vm358_vm5, %v2382_v3 }
 0x220   :  { %1969 = vmatprep.mubr.msk.f32.mxu0 %vm2295_vm0, %v2296_v1  ;;  %1958 = vmatprep.mubr.msk.f32.mxu1 %vm2295_vm0, %v2296_v1 }
 0x221   :  { %2155 = vmatprep.subr.bf16.mxu1 %v2293_v0  ;;  %2167 = vmatprep.subr.bf16.mxu0 %v2293_v0 }
 0x222   :  { %2157 = vmatpush3.bf16.msra.mxu1 %v2156_v11  ;;  %2169 = vmatpush3.bf16.msra.mxu0 %v2168_v40 }
 0x223   :  { %1970 = vmatmul.mubr.msk.f32.gmra.mrb[4].mxu0 %vm358_vm5, %v2390_v4  ;;  %1959 = vmatmul.mubr.msk.f32.gmra.mrb[4].mxu1 %vm358_vm5, %v2394_v5 }
 0x224   :  { %1972 = vmatprep.mubr.msk.f32.mxu0 %vm2295_vm0, %v2296_v1  ;;  %1961 = vmatprep.mubr.msk.f32.mxu1 %vm2295_vm0, %v2296_v1 }
 0x225   :  { %2158 = vmatprep.subr.bf16.mxu1 %v2293_v0  ;;  %2170 = vmatprep.subr.bf16.mxu0 %v2293_v0 }
 0x226   :  { %2160 = vmatpush3.bf16.msra.mxu1 %v2159_v13  ;;  %2172 = vmatpush3.bf16.msra.mxu0 %v2171_v43  ;;  %v1788_v13 = vld [vmem:[%s1749_s24] ss:$0 sm:$0xff]  ;;  %s1755_s24 = sld [smem:[%s2608_s0 + %s2316_s21]]  }
 0x227   :  { %1973 = vmatmul.mubr.msk.f32.gmra.mrb[6].mxu0 %vm358_vm5, %v2404_v6  ;;  %1962 = vmatmul.mubr.msk.f32.gmra.mrb[6].mxu1 %vm358_vm5, %v2408_v7 }
 0x228   :  { %1991 = vmatprep.mubr.msk.f32.mxu1 %vm2295_vm0, %v2296_v1  ;;  %2008 = vmatprep.mubr.msk.f32.mxu0 %vm2295_vm0, %v2296_v1 }
 0x229   :  { %2161 = vmatprep.subr.bf16.mxu1 %v2293_v0  ;;  %2176 = vmatprep.subr.bf16.mxu0 %v2293_v0 }
 0x22a   :  { %2163 = vmatpush3.bf16.msra.mxu1 %v2162_v16 }
 0x22b   :  { %2164 = vmatprep.subr.bf16.mxu1 %v2293_v0 }
 0x22e   :  { %2166 = vmatpush3.bf16.msra.mxu1 %v2165_v19 }
 0x22f   :  { %2173 = vmatprep.subr.bf16.mxu1 %v2293_v0 }
 0x2f2   :  { %v523_v20 = vpop.f32.mrb[2].mxu0  ;;  %v434_v21 = vpop.f32.mrb[2].mxu1 }
 0x2f3   :  { %540 = vrot.lane.b32.xlu0 %v523_v20, %s2305_s12  ;;  %v1968_v22 = vpop.f32.mrb[3].mxu0  ;;  %v1957_v23 = vpop.f32.mrb[3].mxu1 }
 0x2f6   :  { %v528_v24 = vpop.f32.mrb[4].mxu0  ;;  %v439_v25 = vpop.f32.mrb[4].mxu1 }
 0x2f7   :  { %542 = vrot.lane.b32.xlu0 %v528_v24, %s2305_s12  ;;  %v1971_v26 = vpop.f32.mrb[5].mxu0  ;;  %v1960_v27 = vpop.f32.mrb[5].mxu1 }
 0x2fa   :  { %v533_v28 = vpop.f32.mrb[6].mxu0  ;;  %v444_v29 = vpop.f32.mrb[6].mxu1 }
 0x2fb   :  { %544 = vrot.lane.b32.xlu1 %v533_v28, %s2305_s12  ;;  %v1974_v30 = vpop.f32.mrb[7].mxu0  ;;  %v1963_v31 = vpop.f32.mrb[7].mxu1 }
 0x365   :  { %v541_v32 = vpop.permute.xlu0 %540 }
 0x366   :  { %v549_v33 = vsel %vm240_vm2, %v434_v21, %v541_v32 }
 0x367   :  { %1992 = vmatmul.mubr.msk.f32.vlgmr.msra.gmra.mrb[8].mxu1 %vm149_vm1, %v549_v33 }
 0x368   :  { %1994 = vmatprep.mubr.msk.f32.mxu1 %vm2295_vm0, %v2296_v1 }
 0x369   :  { %v543_v34 = vpop.permute.xlu0 %542 }
 0x36a   :  { %v550_v35 = vsel %vm240_vm2, %v439_v25, %v543_v34 }
 0x36b   :  { %1995 = vmatmul.mubr.msk.f32.gmra.mrb[10].mxu1 %vm149_vm1, %v550_v35 }
 0x36c   :  { %1997 = vmatprep.mubr.msk.f32.mxu1 %vm2295_vm0, %v2296_v1 }
 0x36d   :  { %v545_v36 = vpop.permute.xlu1 %544 }
 0x36e   :  { %v551_v37 = vsel %vm240_vm2, %v444_v29, %v545_v36 }
 0x36f   :  { %1998 = vmatmul.mubr.msk.f32.gmra.mrb[12].mxu1 %vm149_vm1, %v551_v37 }
 0x370   :  { %2023 = vmatprep.mubr.msk.f32.mxu1 %vm2295_vm0, %v2296_v1 }
 0x43a   :  { %v642_v45 = vpop.f32.mrb[8].mxu1 }
 0x43b   :  { %v643_v46 = vadd.f32 %v1781_v44, %v642_v45  ;;  %v1993_v47 = vpop.f32.mrb[9].mxu1 }
 0x43d   :  { %v659_v48 = vmin.f32 %v643_v46, 0.0  ;;  %vm656_vm6 = vcmp.gt.f32.partialorder %v643_v46, 0.0 }
 0x43e   :  { %v647_v49 = vpop.f32.mrb[10].mxu1 }
 0x43f   :  { %v662_v50 = vmul.f32 1.442695, %v659_v48  ;;  %v648_v51 = vadd.f32 %v1781_v44, %v647_v49  ;;  %v1996_v52 = vpop.f32.mrb[11].mxu1 }
 0x441   :  { %2259 = vpow2.f32 %v662_v50  ;;  %v660_v53 = vmin.f32 %v648_v51, 0.0  ;;  %vm657_vm7 = vcmp.gt.f32.partialorder %v648_v51, 0.0 }
 0x442   :  { %v652_v54 = vpop.f32.mrb[12].mxu1 }
 0x443   :  { %v664_v55 = vmul.f32 1.442695, %v660_v53  ;;  %v653_v56 = vadd.f32 %v1781_v44, %v652_v54  ;;  %v1999_v57 = vpop.f32.mrb[13].mxu1 }
 0x445   :  { %2261 = vpow2.f32 %v664_v55  ;;  %v661_v58 = vmin.f32 %v653_v56, 0.0  ;;  %vm658_vm8 = vcmp.gt.f32.partialorder %v653_v56, 0.0 }
 0x447   :  { %v666_v59 = vmul.f32 1.442695, %v661_v58 }
 0x449   :  { %2263 = vpow2.f32 %v666_v59 }
 0x44b   :  { %v2260_v60 = vpop.eup %2259 }
 0x44c   :  { %v1785_v61 = vadd.f32 -1.0, %v2260_v60 }
 0x44e   :  { %v671_v62 = vsel %vm656_vm6, %v643_v46, %v1785_v61 }
 0x44f   :  { %v2262_v63 = vpop.eup %2261  ;;  %2009 = vmatmul.mubr.msk.f32.vlgmr.msra.gmra.mrb[8].mxu0 %vm240_vm2, %v671_v62 }
 0x450   :  { %2011 = vmatprep.mubr.msk.f32.mxu0 %vm2295_vm0, %v2296_v1  ;;  %v1786_v8 = vadd.f32 -1.0, %v2262_v63 }
 0x452   :  { %v672_v9 = vsel %vm657_vm7, %v648_v51, %v1786_v8 }
 0x453   :  { %v2264_v10 = vpop.eup %2263  ;;  %2012 = vmatmul.mubr.msk.f32.gmra.mrb[10].mxu0 %vm240_vm2, %v672_v9 }
 0x454   :  { %2014 = vmatprep.mubr.msk.f32.mxu0 %vm2295_vm0, %v2296_v1  ;;  %v1787_v11 = vadd.f32 -1.0, %v2264_v10 }
 0x456   :  { %v673_v12 = vsel %vm658_vm8, %v653_v56, %v1787_v11 }
 0x457   :  { %2015 = vmatmul.mubr.msk.f32.gmra.mrb[12].mxu0 %vm240_vm2, %v673_v12 }
 0x458   :  { %2034 = vmatprep.mubr.msk.f32.mxu0 %vm2295_vm0, %v2296_v1 }
 0x522   :  { %v760_v14 = vpop.f32.mrb[8].mxu0 }
 0x523   :  { %v761_v15 = vadd.f32 %v1788_v13, %v760_v14  ;;  %v2010_v16 = vpop.f32.mrb[9].mxu0  ;;  %v1795_v14 = vld [vmem:[%s1750_s28] ss:$0 sm:$0xff]  ;;  %s1756_s28 = sld [smem:[%s2608_s0 + %s2317_s25]]  }
 0x525   :  { %v777_v17 = vmin.f32 %v761_v15, 0.0  ;;  %vm774_vm9 = vcmp.gt.f32.partialorder %v761_v15, 0.0 }
 0x526   :  { %v765_v18 = vpop.f32.mrb[10].mxu0 }
 0x527   :  { %v780_v19 = vmul.f32 1.442695, %v777_v17  ;;  %v766_v20 = vadd.f32 %v1788_v13, %v765_v18  ;;  %v2013_v21 = vpop.f32.mrb[11].mxu0  ;;  %v1796_v18 = vld [vmem:[%s1751_s2] ss:$0 sm:$0xff]  ;;  %s1757_s2 = sld [smem:[%s2608_s0 + %s2318_s29]]  }
 0x529   :  { %2265 = vpow2.f32 %v780_v19  ;;  %v778_v22 = vmin.f32 %v766_v20, 0.0  ;;  %vm775_vm10 = vcmp.gt.f32.partialorder %v766_v20, 0.0 }
 0x52a   :  { %v770_v23 = vpop.f32.mrb[12].mxu0 }
 0x52b   :  { %v782_v24 = vmul.f32 1.442695, %v778_v22  ;;  %v771_v25 = vadd.f32 %v1788_v13, %v770_v23  ;;  %v2016_v26 = vpop.f32.mrb[13].mxu0 }
 0x52c   :  { %v924_v26 = vld [vmem:[%s1752_s6 + $0x8] sm:$0xff] }
 0x52d   :  { %2267 = vpow2.f32 %v782_v24  ;;  %v779_v27 = vmin.f32 %v771_v25, 0.0  ;;  %vm776_vm11 = vcmp.gt.f32.partialorder %v771_v25, 0.0 }
 0x52f   :  { %v784_v28 = vmul.f32 1.442695, %v779_v27 }
 0x531   :  { %2269 = vpow2.f32 %v784_v28 }
 0x533   :  { %v2266_v29 = vpop.eup %2265 }
 0x534   :  { %v1792_v30 = vadd.f32 -1.0, %v2266_v29  ;;  %v132_v29 = vld [vmem:[%s1739_s10] sm:$0xff]  ;;  %s2321_s10 = smov 23  }
 0x535   :  { %s1759_s14 = sld [smem:[%s2608_s0 + %s2321_s10]]  }
 0x536   :  { %v789_v32 = vsel %vm774_vm9, %v761_v15, %v1792_v30  ;;  %v925_v30 = vld [vmem:[%s1752_s6 + $0x10] sm:$0xff] }
 0x537   :  { %v2268_v31 = vpop.eup %2267  ;;  %v792_v36 = vsel %vm240_vm2, %v789_v32, 0.0 }
 0x538   :  { %v1793_v33 = vadd.f32 -1.0, %v2268_v31  ;;  %v926_v31 = vld [vmem:[%s1752_s6 + $0x18] sm:$0xff] }
 0x53a   :  { %v790_v34 = vsel %vm775_vm10, %v766_v20, %v1793_v33 }
 0x53b   :  { %v2270_v35 = vpop.eup %2269  ;;  %v793_v37 = vsel %vm240_vm2, %v790_v34, 0.0 }
 0x53c   :  { %v794_v38 = vadd.f32 %v793_v37, %v792_v36  ;;  %v1794_v39 = vadd.f32 -1.0, %v2270_v35  ;;  %v1013_v36 = vld [vmem:[%s1754_s16] sm:$0xff]  ;;  %v1014_v37 = vld [vmem:[%s1754_s16 + $0x8] sm:$0xff] }
 0x53e   :  { %v791_v40 = vsel %vm776_vm11, %v771_v25, %v1794_v39  ;;  %v923_v25 = vld [vmem:[%s1752_s6] sm:$0xff]  ;;  %v1015_v39 = vld [vmem:[%s1754_s16 + $0x10] sm:$0xff]  ;;  %s1758_s6 = sld [smem:[%s2608_s0 + %s2319_s3]]  }
 0x53f   :  { %v795_v41 = vsel %vm240_vm2, %v791_v40, 0.0  ;;  %v2177_v27 = vpack.c.bf16 %v924_v26, %v923_v25  ;;  %v1805_v26 = vld [vmem:[%s1757_s2] ss:$0 sm:$0xff] }
 0x540   :  { %v796_v42 = vadd.f32 %v795_v41, %v794_v38  ;;  %v2183_v38 = vpack.c.bf16 %v1014_v37, %v1013_v36 }
 0x541   :  { %2178 = vmatpush3.bf16.msra.mxu0 %v2177_v27 }
 0x542   :  { %v797_v43 = vrot.slane %v796_v42, 4  ;;  %2179 = vmatprep.subr.bf16.mxu0 %v2293_v0 }
 0x544   :  { %v798_v44 = vadd.f32 %v797_v43, %v796_v42  ;;  %v1798_v42 = vld [vmem:[%s1753_s20] ss:$0 sm:$0xff]  ;;  %v1339_v36 = vld [vmem:[%s1758_s6 + $0x48] sm:$0xff] }
 0x546   :  { %v799_v45 = vrot.slane %v798_v44, 2 }
 0x548   :  { %v800_v46 = vadd.f32 %v799_v45, %v798_v44 }
 0x54a   :  { %v801_v47 = vrot.slane %v800_v46, 1 }
 0x54c   :  { %v802_v48 = vadd.f32 %v801_v47, %v800_v46 }
 0x54e   :  { %v804_v49 = vmul.f32 0.041666668, %v802_v48 }
 0x550   :  { %v805_v50 = vsub.f32 %v789_v32, %v804_v49  ;;  %v806_v51 = vsub.f32 %v790_v34, %v804_v49  ;;  %v807_v52 = vsub.f32 %v791_v40, %v804_v49  ;;  %v2180_v32 = vpack.c.bf16 %v926_v31, %v925_v30  ;;  %v1016_v40 = vld [vmem:[%s1754_s16 + $0x18] sm:$0xff]  ;;  %v1335_v30 = vld [vmem:[%s1758_s6 + $0x28] sm:$0xff] }
 0x551   :  { %v2186_v41 = vpack.c.bf16 %v1016_v40, %v1015_v39  ;;  %v1341_v39 = vld [vmem:[%s1758_s6 + $0x58] sm:$0xff] }
 0x552   :  { %v808_v53 = vmul.f32 %v805_v50, %v805_v50  ;;  %v809_v54 = vmul.f32 %v806_v51, %v806_v51  ;;  %v810_v55 = vmul.f32 %v807_v52, %v807_v52  ;;  %2181 = vmatpush3.bf16.msra.mxu0 %v2180_v32  ;;  %v1336_v32 = vld [vmem:[%s1758_s6 + $0x30] sm:$0xff] }
 0x553   :  { %2048 = vmatprep.subr.mxu0 %v2296_v1 }
 0x554   :  { %v811_v56 = vsel %vm240_vm2, %v808_v53, 0.0  ;;  %v812_v57 = vsel %vm240_vm2, %v809_v54, 0.0  ;;  %v814_v59 = vsel %vm240_vm2, %v810_v55, 0.0 }
 0x555   :  { %v813_v58 = vadd.f32 %v812_v57, %v811_v56 }
 0x557   :  { %v815_v60 = vadd.f32 %v814_v59, %v813_v58 }
 0x559   :  { %v816_v61 = vrot.slane %v815_v60, 4 }
 0x55b   :  { %v817_v62 = vadd.f32 %v816_v61, %v815_v60 }
 0x55d   :  { %v818_v63 = vrot.slane %v817_v62, 2 }
 0x55f   :  { %v819_v8 = vadd.f32 %v818_v63, %v817_v62 }
 0x561   :  { %v820_v9 = vrot.slane %v819_v8, 1 }
 0x563   :  { %v821_v10 = vadd.f32 %v820_v9, %v819_v8 }
 0x565   :  { %v822_v11 = vmul.f32 0.041666668, %v821_v10 }
 0x567   :  { %v823_v12 = vadd.f32 1e-05, %v822_v11 }
 0x569   :  { %2271 = vrsqrt.f32 %v823_v12 }
 0x573   :  { %v2272_v13 = vpop.eup %2271 }
 0x574   :  { %v827_v15 = vmul.f32 %v2272_v13, %v807_v52  ;;  %v825_v16 = vmul.f32 %v2272_v13, %v805_v50  ;;  %v826_v17 = vmul.f32 %v2272_v13, %v806_v51  ;;  %v1801_v51 = vld [vmem:[%s1755_s24] ss:$0 sm:$0xff] }
 0x576   :  { %v835_v19 = vmul.f32 %v1795_v14, %v825_v16  ;;  %v836_v20 = vmul.f32 %v1795_v14, %v826_v17  ;;  %v837_v24 = vmul.f32 %v1795_v14, %v827_v15 }
 0x578   :  { %v845_v21 = vadd.f32 %v1796_v18, %v835_v19  ;;  %v846_v22 = vadd.f32 %v1796_v18, %v836_v20  ;;  %v847_v28 = vadd.f32 %v1796_v18, %v837_v24  ;;  %v1804_v24 = vld [vmem:[%s1756_s28] ss:$0 sm:$0xff] }
 0x57a   :  { %1315 = vrot.lane.b32.xlu0 %v845_v21, %s2313_s11  ;;  %v2174_v23 = vpack.c.bf16 %v846_v22, %v845_v21 }
 0x57c   :  { %2175 = vmatpush3.bf16.msra.mxu1 %v2174_v23 }
 0x57d   :  { %2021 = vmatprep.subr.mxu1 %v2296_v1 }
 0x57e   :  { %1317 = vrot.lane.b32.xlu0 %v846_v22, %s2313_s11 }
 0x580   :  { %2022 = vmatpush3.msra.mxu1 %v847_v28 }
 0x581   :  { %2024 = vmatmul.mubr.msk.f32.vlgmr.msra.gmra.mrb[14].mxu1 %vm848_vm12, %v132_v29  ;;  %2182 = vmatprep.subr.bf16.mxu1 %v2293_v0  ;;  %v1333_v29 = vld [vmem:[%s1758_s6 + $0x18] sm:$0xff] }
 0x582   :  { %1319 = vrot.lane.b32.xlu0 %v847_v28, %s2313_s11  ;;  %2045 = vmatprep.mubr.msk.f32.mxu1 %vm2295_vm0, %v2296_v1 }
 0x583   :  { %2184 = vmatpush3.bf16.msra.mxu1 %v2183_v38  ;;  %v1340_v38 = vld [vmem:[%s1758_s6 + $0x50] sm:$0xff] }
 0x584   :  { %2185 = vmatprep.subr.bf16.mxu1 %v2293_v0  ;;  %v2204_v40 = vpack.c.bf16 %v1341_v39, %v1340_v38  ;;  %v1633_v38 = vld [vmem:[%s1764_s18 + $0x18] sm:$0xff] }
 0x587   :  { %2187 = vmatpush3.bf16.msra.mxu1 %v2186_v41 }
 0x588   :  { %2059 = vmatprep.subr.mxu1 %v2296_v1 }
 0x654   :  { %v918_v33 = vpop.f32.mrb[14].mxu1 }
 0x655   :  { %v922_v34 = vmul.f32 0.25, %v918_v33  ;;  %v2025_v35 = vpop.f32.mrb[15].mxu1  ;;  %v1337_v33 = vld [vmem:[%s1758_s6 + $0x38] sm:$0xff] }
 0x656   :  { %v1338_v35 = vld [vmem:[%s1758_s6 + $0x40] sm:$0xff] }
 0x657   :  { %2035 = vmatmul.mubr.msk.f32.vlgmr.msra.gmra.mrb[14].mxu0 %vm240_vm2, %v922_v34  ;;  %v2198_v34 = vpack.c.bf16 %v1337_v33, %v1336_v32  ;;  %v2201_v37 = vpack.c.bf16 %v1339_v36, %v1338_v35  ;;  %v1631_v35 = vld [vmem:[%s1764_s18 + $0x8] sm:$0xff] }
 0x658   :  { %2050 = vmatprep.mubr.msk.f32.mxu0 %vm2295_vm0, %v2296_v1 }
 0x72a   :  { %v1003_v43 = vpop.f32.mrb[14].mxu0 }
 0x72b   :  { %v1004_v44 = vadd.f32 %v1798_v42, %v1003_v43  ;;  %v2036_v45 = vpop.f32.mrb[15].mxu0 }
 0x72d   :  { %v1008_v46 = vmin.f32 %v1004_v44, 0.0  ;;  %vm1007_vm13 = vcmp.gt.f32.partialorder %v1004_v44, 0.0 }
 0x72f   :  { %v1009_v47 = vmul.f32 1.442695, %v1008_v46 }
 0x731   :  { %2273 = vpow2.f32 %v1009_v47 }
 0x73b   :  { %v2274_v48 = vpop.eup %2273 }
 0x73c   :  { %v1800_v49 = vadd.f32 -1.0, %v2274_v48 }
 0x73e   :  { %v1012_v50 = vsel %vm1007_vm13, %v1004_v44, %v1800_v49 }
 0x73f   :  { %2046 = vmatmul.mubr.msk.f32.vlgmr.msra.gmra.mrb[16].mxu1 %vm240_vm2, %v1012_v50 }
 0x740   :  { %2061 = vmatprep.mubr.msk.f32.mxu1 %vm2295_vm0, %v2296_v1 }
 0x812   :  { %v1093_v52 = vpop.f32.mrb[16].mxu1 }
 0x813   :  { %v1094_v53 = vadd.f32 %v1801_v51, %v1093_v52  ;;  %v2047_v54 = vpop.f32.mrb[17].mxu1 }
 0x815   :  { %v1098_v55 = vmin.f32 %v1094_v53, 0.0  ;;  %vm1097_vm14 = vcmp.gt.f32.partialorder %v1094_v53, 0.0 }
 0x817   :  { %v1099_v56 = vmul.f32 1.442695, %v1098_v55 }
 0x819   :  { %2275 = vpow2.f32 %v1099_v56 }
 0x823   :  { %v2276_v57 = vpop.eup %2275 }
 0x824   :  { %v1803_v58 = vadd.f32 -1.0, %v2276_v57 }
 0x826   :  { %v1102_v59 = vsel %vm1097_vm14, %v1094_v53, %v1803_v58  ;;  %v1316_v53 = vpop.permute.xlu0 %1315 }
 0x827   :  { %v1103_v60 = vsel %vm240_vm2, %v1102_v59, 0.0 }
 0x828   :  { %v1104_v61 = vrot.slane %v1103_v60, 4 }
 0x82a   :  { %v1105_v62 = vadd.f32 %v1104_v61, %v1103_v60  ;;  %v1318_v57 = vpop.permute.xlu0 %1317 }
 0x82c   :  { %v1106_v63 = vrot.slane %v1105_v62, 2 }
 0x82e   :  { %v1107_v8 = vadd.f32 %v1106_v63, %v1105_v62  ;;  %v1320_v62 = vpop.permute.xlu0 %1319 }
 0x830   :  { %v1108_v9 = vrot.slane %v1107_v8, 1 }
 0x832   :  { %v1109_v10 = vadd.f32 %v1108_v9, %v1107_v8 }
 0x834   :  { %v1110_v11 = vmul.f32 0.125, %v1109_v10 }
 0x836   :  { %v1111_v12 = vsub.f32 %v1102_v59, %v1110_v11 }
 0x838   :  { %v1112_v13 = vmul.f32 %v1111_v12, %v1111_v12 }
 0x83a   :  { %v1113_v14 = vsel %vm240_vm2, %v1112_v13, 0.0 }
 0x83b   :  { %v1114_v15 = vrot.slane %v1113_v14, 4 }
 0x83d   :  { %v1115_v16 = vadd.f32 %v1114_v15, %v1113_v14  ;;  %v1812_v15 = vld [vmem:[%s1759_s14] ss:$0 sm:$0xff] }
 0x83f   :  { %v1116_v17 = vrot.slane %v1115_v16, 2 }
 0x841   :  { %v1117_v18 = vadd.f32 %v1116_v17, %v1115_v16 }
 0x843   :  { %v1118_v19 = vrot.slane %v1117_v18, 1 }
 0x845   :  { %v1119_v20 = vadd.f32 %v1118_v19, %v1117_v18 }
 0x847   :  { %v1120_v21 = vmul.f32 0.125, %v1119_v20 }
 0x849   :  { %v1121_v22 = vadd.f32 1e-05, %v1120_v21 }
 0x84b   :  { %2277 = vrsqrt.f32 %v1121_v22 }
 0x855   :  { %v2278_v23 = vpop.eup %2277 }
 0x856   :  { %v1123_v25 = vmul.f32 %v2278_v23, %v1111_v12 }
 0x858   :  { %v1131_v27 = vmul.f32 %v1804_v24, %v1123_v25 }
 0x85a   :  { %v1139_v28 = vadd.f32 %v1805_v26, %v1131_v27 }
 0x85c   :  { %2049 = vmatpush3.msra.mxu0 %v1139_v28  ;;  %2060 = vmatpush3.msra.mxu1 %v1139_v28 }
 0x85d   :  { %2062 = vmatmul.mubr.msk.f32.vlgmr.msra.gmra.mrb[18].mxu1 %vm358_vm5, %v2380_v2  ;;  %2051 = vmatmul.mubr.msk.f32.vlgmr.msra.gmra.mrb[16].mxu0 %vm358_vm5, %v2382_v3  ;;  %v1330_v2 = vld [vmem:[%s1758_s6] sm:$0xff]  ;;  %v1331_v3 = vld [vmem:[%s1758_s6 + $0x8] sm:$0xff] }
 0x85e   :  { %2064 = vmatprep.mubr.msk.f32.mxu1 %vm2295_vm0, %v2296_v1  ;;  %2053 = vmatprep.mubr.msk.f32.mxu0 %vm2295_vm0, %v2296_v1 }
 0x85f   :  { %2188 = vmatprep.subr.bf16.mxu0 %v2293_v0  ;;  %2206 = vmatprep.subr.bf16.mxu1 %v2293_v0 }
 0x861   :  { %2065 = vmatmul.mubr.msk.f32.gmra.mrb[20].mxu1 %vm358_vm5, %v2390_v4  ;;  %2054 = vmatmul.mubr.msk.f32.gmra.mrb[18].mxu0 %vm358_vm5, %v2394_v5  ;;  %v1332_v4 = vld [vmem:[%s1758_s6 + $0x10] sm:$0xff]  ;;  %v2189_v5 = vpack.c.bf16 %v1331_v3, %v1330_v2 }
 0x862   :  { %2067 = vmatprep.mubr.msk.f32.mxu1 %vm2295_vm0, %v2296_v1  ;;  %2056 = vmatprep.mubr.msk.f32.mxu0 %vm2295_vm0, %v2296_v1 }
 0x863   :  { %2190 = vmatpush3.bf16.msra.mxu0 %v2189_v5 }
 0x864   :  { %2191 = vmatprep.subr.bf16.mxu0 %v2293_v0 }
 0x865   :  { %2068 = vmatmul.mubr.msk.f32.gmra.mrb[22].mxu1 %vm358_vm5, %v2404_v6  ;;  %2057 = vmatmul.mubr.msk.f32.gmra.mrb[20].mxu0 %vm358_vm5, %v2408_v7  ;;  %v2192_v6 = vpack.c.bf16 %v1333_v29, %v1332_v4  ;;  %v1334_v7 = vld [vmem:[%s1758_s6 + $0x20] sm:$0xff] }
 0x866   :  { %2094 = vmatprep.mubr.msk.f32.mxu0 %vm2295_vm0, %v2296_v1  ;;  %2111 = vmatprep.mubr.msk.f32.mxu1 %vm2295_vm0, %v2296_v1  ;;  %v2195_v31 = vpack.c.bf16 %v1335_v30, %v1334_v7 }
 0x867   :  { %2193 = vmatpush3.bf16.msra.mxu0 %v2192_v6 }
 0x868   :  { %2194 = vmatprep.subr.bf16.mxu0 %v2293_v0 }
 0x86b   :  { %2196 = vmatpush3.bf16.msra.mxu0 %v2195_v31 }
 0x86c   :  { %2197 = vmatprep.subr.bf16.mxu0 %v2293_v0 }
 0x86f   :  { %2199 = vmatpush3.bf16.msra.mxu0 %v2198_v34  ;;  %v1630_v34 = vld [vmem:[%s1764_s18] sm:$0xff] }
 0x870   :  { %2200 = vmatprep.subr.bf16.mxu0 %v2293_v0  ;;  %v2213_v36 = vpack.c.bf16 %v1631_v35, %v1630_v34  ;;  %v1826_v34 = vld [vmem:[%s1762_s26] ss:$0 sm:$0xff] }
 0x873   :  { %2202 = vmatpush3.bf16.msra.mxu0 %v2201_v37  ;;  %v1632_v37 = vld [vmem:[%s1764_s18 + $0x10] sm:$0xff] }
 0x874   :  { %2203 = vmatprep.subr.bf16.mxu0 %v2293_v0  ;;  %v2216_v39 = vpack.c.bf16 %v1633_v38, %v1632_v37  ;;  %v1827_v38 = vld [vmem:[%s1763_s30] ss:$0 sm:$0xff] }
 0x877   :  { %2205 = vmatpush3.bf16.msra.mxu0 %v2204_v40  ;;  %v1819_v40 = vld [vmem:[%s1761_s22] ss:$0 sm:$0xff] }
 0x930   :  { %v1286_v41 = vpop.f32.mrb[18].mxu1  ;;  %v1206_v42 = vpop.f32.mrb[16].mxu0 }
 0x931   :  { %1303 = vrot.lane.b32.xlu1 %v1286_v41, %s2305_s12  ;;  %v2063_v43 = vpop.f32.mrb[19].mxu1  ;;  %v2052_v44 = vpop.f32.mrb[17].mxu0 }
 0x934   :  { %v1291_v45 = vpop.f32.mrb[20].mxu1  ;;  %v1211_v46 = vpop.f32.mrb[18].mxu0 }
 0x935   :  { %1305 = vrot.lane.b32.xlu1 %v1291_v45, %s2305_s12  ;;  %v2066_v47 = vpop.f32.mrb[21].mxu1  ;;  %v2055_v48 = vpop.f32.mrb[19].mxu0 }
 0x938   :  { %v1296_v49 = vpop.f32.mrb[22].mxu1  ;;  %v1216_v50 = vpop.f32.mrb[20].mxu0 }
 0x939   :  { %1307 = vrot.lane.b32.xlu1 %v1296_v49, %s2305_s12  ;;  %v2069_v51 = vpop.f32.mrb[23].mxu1  ;;  %v2058_v52 = vpop.f32.mrb[21].mxu0  ;;  %s2320_s12 = smov 24  }
 0x93a   :  { %s1760_s9 = sld [smem:[%s2608_s0 + %s2320_s12]]  }
 0x940   :  { %v1457_v9 = vld [vmem:[%s1760_s9] sm:$0xff]  ;;  %v1458_v10 = vld [vmem:[%s1760_s9 + $0x8] sm:$0xff]  ;;  %v1459_v12 = vld [vmem:[%s1760_s9 + $0x10] sm:$0xff] }
 0x941   :  { %v2207_v11 = vpack.c.bf16 %v1458_v10, %v1457_v9  ;;  %v1460_v13 = vld [vmem:[%s1760_s9 + $0x18] sm:$0xff] }
 0x942   :  { %v2210_v14 = vpack.c.bf16 %v1460_v13, %v1459_v12 }
 0x943   :  { %2208 = vmatpush3.bf16.msra.mxu1 %v2207_v11 }
 0x944   :  { %2209 = vmatprep.subr.bf16.mxu1 %v2293_v0 }
 0x947   :  { %2211 = vmatpush3.bf16.msra.mxu1 %v2210_v14 }
 0x948   :  { %2212 = vmatprep.subr.bf16.mxu1 %v2293_v0 }
 0x9a3   :  { %v1304_v54 = vpop.permute.xlu1 %1303 }
 0x9a4   :  { %v1324_v55 = vsel %vm240_vm2, %v1206_v42, %v1304_v54 }
 0x9a5   :  { %v1327_v56 = vsel %vm149_vm1, %v1324_v55, %v1316_v53 }
 0x9a6   :  { %2095 = vmatmul.mubr.msk.f32.vlgmr.msra.gmra.mrb[22].mxu0 %vm1349_vm15, %v1327_v56 }
 0x9a7   :  { %v1306_v58 = vpop.permute.xlu1 %1305  ;;  %2097 = vmatprep.mubr.msk.f32.mxu0 %vm2295_vm0, %v2296_v1 }
 0x9a8   :  { %v1325_v59 = vsel %vm240_vm2, %v1211_v46, %v1306_v58 }
 0x9a9   :  { %v1328_v60 = vsel %vm149_vm1, %v1325_v59, %v1318_v57 }
 0x9aa   :  { %2098 = vmatmul.mubr.msk.f32.gmra.mrb[24].mxu0 %vm1349_vm15, %v1328_v60 }
 0x9ab   :  { %v1308_v61 = vpop.permute.xlu1 %1307  ;;  %2100 = vmatprep.mubr.msk.f32.mxu0 %vm2295_vm0, %v2296_v1 }
 0x9ac   :  { %v1326_v63 = vsel %vm240_vm2, %v1216_v50, %v1308_v61 }
 0x9ad   :  { %v1329_v8 = vsel %vm149_vm1, %v1326_v63, %v1320_v62 }
 0x9ae   :  { %2101 = vmatmul.mubr.msk.f32.gmra.mrb[26].mxu0 %vm1349_vm15, %v1329_v8 }
 0xa79   :  { %v1425_v16 = vpop.f32.mrb[22].mxu0 }
 0xa7a   :  { %v1426_v17 = vadd.f32 %v1812_v15, %v1425_v16  ;;  %v2096_v18 = vpop.f32.mrb[23].mxu0 }
 0xa7c   :  { %v1442_v19 = vmin.f32 %v1426_v17, 0.0  ;;  %vm1439_vm1 = vcmp.gt.f32.partialorder %v1426_v17, 0.0 }
 0xa7d   :  { %v1430_v20 = vpop.f32.mrb[24].mxu0 }
 0xa7e   :  { %v1445_v21 = vmul.f32 1.442695, %v1442_v19  ;;  %v1431_v22 = vadd.f32 %v1812_v15, %v1430_v20  ;;  %v2099_v23 = vpop.f32.mrb[25].mxu0 }
 0xa80   :  { %2279 = vpow2.f32 %v1445_v21  ;;  %v1443_v24 = vmin.f32 %v1431_v22, 0.0  ;;  %vm1440_vm3 = vcmp.gt.f32.partialorder %v1431_v22, 0.0 }
 0xa81   :  { %v1435_v25 = vpop.f32.mrb[26].mxu0 }
 0xa82   :  { %v1447_v26 = vmul.f32 1.442695, %v1443_v24  ;;  %v1436_v27 = vadd.f32 %v1812_v15, %v1435_v25  ;;  %v2102_v28 = vpop.f32.mrb[27].mxu0 }
 0xa84   :  { %2281 = vpow2.f32 %v1447_v26  ;;  %v1444_v2 = vmin.f32 %v1436_v27, 0.0  ;;  %vm1441_vm4 = vcmp.gt.f32.partialorder %v1436_v27, 0.0 }
 0xa86   :  { %v1449_v3 = vmul.f32 1.442695, %v1444_v2 }
 0xa88   :  { %2283 = vpow2.f32 %v1449_v3 }
 0xa8a   :  { %v2280_v4 = vpop.eup %2279 }
 0xa8b   :  { %v1816_v5 = vadd.f32 -1.0, %v2280_v4 }
 0xa8d   :  { %v1454_v29 = vsel %vm1439_vm1, %v1426_v17, %v1816_v5 }
 0xa8e   :  { %v2282_v6 = vpop.eup %2281  ;;  %2112 = vmatmul.mubr.msk.f32.vlgmr.msra.gmra.mrb[24].mxu1 %vm240_vm2, %v1454_v29 }
 0xa8f   :  { %2114 = vmatprep.mubr.msk.f32.mxu1 %vm2295_vm0, %v2296_v1  ;;  %v1817_v7 = vadd.f32 -1.0, %v2282_v6  ;;  %2214 = vmatpush3.bf16.msra.mxu1 %v2213_v36 }
 0xa90   :  { %2215 = vmatprep.subr.bf16.mxu1 %v2293_v0 }
 0xa91   :  { %v1455_v30 = vsel %vm1440_vm3, %v1431_v22, %v1817_v7 }
 0xa92   :  { %v2284_v31 = vpop.eup %2283  ;;  %2115 = vmatmul.mubr.msk.f32.gmra.mrb[26].mxu1 %vm240_vm2, %v1455_v30 }
 0xa93   :  { %2117 = vmatprep.mubr.msk.f32.mxu1 %vm2295_vm0, %v2296_v1  ;;  %v1818_v32 = vadd.f32 -1.0, %v2284_v31  ;;  %2217 = vmatpush3.bf16.msra.mxu1 %v2216_v39 }
 0xa95   :  { %v1456_v33 = vsel %vm1441_vm4, %v1436_v27, %v1818_v32 }
 0xa96   :  { %2118 = vmatmul.mubr.msk.f32.gmra.mrb[28].mxu1 %vm240_vm2, %v1456_v33 }
 0xa97   :  { %2128 = vmatprep.mubr.msk.f32.mxu1 %vm2295_vm0, %v2296_v1 }
 0xb61   :  { %v1543_v41 = vpop.f32.mrb[24].mxu1 }
 0xb62   :  { %v1544_v42 = vadd.f32 %v1819_v40, %v1543_v41  ;;  %v2113_v43 = vpop.f32.mrb[25].mxu1 }
 0xb64   :  { %v1560_v44 = vmin.f32 %v1544_v42, 0.0  ;;  %vm1557_vm6 = vcmp.gt.f32.partialorder %v1544_v42, 0.0 }
 0xb65   :  { %v1548_v45 = vpop.f32.mrb[26].mxu1 }
 0xb66   :  { %v1563_v46 = vmul.f32 1.442695, %v1560_v44  ;;  %v1549_v47 = vadd.f32 %v1819_v40, %v1548_v45  ;;  %v2116_v48 = vpop.f32.mrb[27].mxu1  ;;  %v1828_v45 = vld [vmem:[%s1765_s4] ss:$0 sm:$0xff] }
 0xb68   :  { %2285 = vpow2.f32 %v1563_v46  ;;  %v1561_v0 = vmin.f32 %v1549_v47, 0.0  ;;  %vm1558_vm7 = vcmp.gt.f32.partialorder %v1549_v47, 0.0 }
 0xb69   :  { %v1553_v49 = vpop.f32.mrb[28].mxu1 }
 0xb6a   :  { %v1565_v50 = vmul.f32 1.442695, %v1561_v0  ;;  %v1554_v51 = vadd.f32 %v1819_v40, %v1553_v49  ;;  %v2119_v52 = vpop.f32.mrb[29].mxu1 }
 0xb6c   :  { %2287 = vpow2.f32 %v1565_v50  ;;  %v1562_v53 = vmin.f32 %v1554_v51, 0.0  ;;  %vm1559_vm8 = vcmp.gt.f32.partialorder %v1554_v51, 0.0 }
 0xb6e   :  { %v1567_v54 = vmul.f32 1.442695, %v1562_v53 }
 0xb70   :  { %2289 = vpow2.f32 %v1567_v54 }
 0xb72   :  { %v2286_v55 = vpop.eup %2285 }
 0xb73   :  { %v1823_v56 = vadd.f32 -1.0, %v2286_v55 }
 0xb75   :  { %v1572_v58 = vsel %vm1557_vm6, %v1544_v42, %v1823_v56 }
 0xb76   :  { %v2288_v57 = vpop.eup %2287  ;;  %v1575_v62 = vsel %vm240_vm2, %v1572_v58, 0.0 }
 0xb77   :  { %v1824_v59 = vadd.f32 -1.0, %v2288_v57 }
 0xb79   :  { %v1573_v60 = vsel %vm1558_vm7, %v1549_v47, %v1824_v59 }
 0xb7a   :  { %v2290_v61 = vpop.eup %2289  ;;  %v1576_v63 = vsel %vm240_vm2, %v1573_v60, 0.0 }
 0xb7b   :  { %v1577_v8 = vadd.f32 %v1576_v63, %v1575_v62  ;;  %v1825_v9 = vadd.f32 -1.0, %v2290_v61 }
 0xb7d   :  { %v1574_v10 = vsel %vm1559_vm8, %v1554_v51, %v1825_v9 }
 0xb7e   :  { %v1578_v11 = vsel %vm240_vm2, %v1574_v10, 0.0 }
 0xb7f   :  { %v1579_v12 = vadd.f32 %v1578_v11, %v1577_v8 }
 0xb81   :  { %v1580_v13 = vrot.slane %v1579_v12, 4 }
 0xb83   :  { %v1581_v14 = vadd.f32 %v1580_v13, %v1579_v12 }
 0xb85   :  { %v1582_v15 = vrot.slane %v1581_v14, 2 }
 0xb87   :  { %v1583_v16 = vadd.f32 %v1582_v15, %v1581_v14 }
 0xb89   :  { %v1584_v17 = vrot.slane %v1583_v16, 1 }
 0xb8b   :  { %v1585_v18 = vadd.f32 %v1584_v17, %v1583_v16 }
 0xb8d   :  { %v1586_v19 = vmul.f32 0.041666668, %v1585_v18 }
 0xb8f   :  { %v1587_v20 = vsub.f32 %v1572_v58, %v1586_v19  ;;  %v1588_v21 = vsub.f32 %v1573_v60, %v1586_v19  ;;  %v1589_v22 = vsub.f32 %v1574_v10, %v1586_v19 }
 0xb91   :  { %v1590_v23 = vmul.f32 %v1587_v20, %v1587_v20  ;;  %v1591_v24 = vmul.f32 %v1588_v21, %v1588_v21  ;;  %v1592_v25 = vmul.f32 %v1589_v22, %v1589_v22 }
 0xb93   :  { %v1593_v26 = vsel %vm240_vm2, %v1590_v23, 0.0  ;;  %v1594_v27 = vsel %vm240_vm2, %v1591_v24, 0.0  ;;  %v1596_v2 = vsel %vm240_vm2, %v1592_v25, 0.0 }
 0xb94   :  { %v1595_v28 = vadd.f32 %v1594_v27, %v1593_v26 }
 0xb96   :  { %v1597_v3 = vadd.f32 %v1596_v2, %v1595_v28 }
 0xb98   :  { %v1598_v4 = vrot.slane %v1597_v3, 4 }
 0xb9a   :  { %v1599_v5 = vadd.f32 %v1598_v4, %v1597_v3 }
 0xb9c   :  { %v1600_v29 = vrot.slane %v1599_v5, 2 }
 0xb9e   :  { %v1601_v6 = vadd.f32 %v1600_v29, %v1599_v5 }
 0xba0   :  { %v1602_v7 = vrot.slane %v1601_v6, 1 }
 0xba2   :  { %v1603_v30 = vadd.f32 %v1602_v7, %v1601_v6 }
 0xba4   :  { %v1604_v31 = vmul.f32 0.041666668, %v1603_v30 }
 0xba6   :  { %v1605_v32 = vadd.f32 1e-05, %v1604_v31 }
 0xba8   :  { %2291 = vrsqrt.f32 %v1605_v32 }
 0xbb2   :  { %v2292_v33 = vpop.eup %2291 }
 0xbb3   :  { %v1607_v35 = vmul.f32 %v2292_v33, %v1587_v20  ;;  %v1609_v36 = vmul.f32 %v2292_v33, %v1589_v22  ;;  %v1608_v37 = vmul.f32 %v2292_v33, %v1588_v21 }
 0xbb5   :  { %v1617_v39 = vmul.f32 %v1826_v34, %v1607_v35  ;;  %v1618_v41 = vmul.f32 %v1826_v34, %v1608_v37  ;;  %v1619_v43 = vmul.f32 %v1826_v34, %v1609_v36 }
 0xbb7   :  { %v1627_v40 = vadd.f32 %v1827_v38, %v1617_v39  ;;  %v1628_v42 = vadd.f32 %v1827_v38, %v1618_v41  ;;  %v1629_v44 = vadd.f32 %v1827_v38, %v1619_v43 }
 0xbb9   :  { %2129 = vmatmul.mubr.msk.f32.vlgmr.msra.gmra.mrb[30].mxu1 %vm240_vm2, %v1627_v40 }
 0xbba   :  { %2131 = vmatprep.mubr.msk.f32.mxu1 %vm2295_vm0, %v2296_v1 }
 0xbbd   :  { %2132 = vmatmul.mubr.msk.f32.gmra.mrb[32].mxu1 %vm240_vm2, %v1628_v42 }
 0xbbe   :  { %2134 = vmatprep.mubr.msk.f32.mxu1 %vm2295_vm0, %v2296_v1 }
 0xbc1   :  { %2135 = vmatmul.mubr.msk.f32.gmra.mrb[34].mxu1 %vm240_vm2, %v1629_v44 }
 0xc8c   :  { %v1716_v46 = vpop.f32.mrb[30].mxu1 }
 0xc8d   :  { %v1717_v47 = vadd.f32 %v1828_v45, %v1716_v46  ;;  %v2130_v48 = vpop.f32.mrb[31].mxu1 }
 0xc8f   :  { %1730 = vst.msk [vmem:[%s1766_s7] sm:$0xff] %vm358_vm5, %v1717_v47 }
 0xc90   :  { %v1721_v1 = vpop.f32.mrb[32].mxu1 }
 0xc91   :  { %v1722_v0 = vadd.f32 %v1828_v45, %v1721_v1  ;;  %v2133_v49 = vpop.f32.mrb[33].mxu1 }
 0xc93   :  { %1731 = vst.msk [vmem:[%s1766_s7 + $0x8] sm:$0xff] %vm358_vm5, %v1722_v0 }
 0xc94   :  { %v1726_v50 = vpop.f32.mrb[34].mxu1 }
 0xc95   :  { %v1727_v51 = vadd.f32 %v1828_v45, %v1726_v50  ;;  %v2136_v52 = vpop.f32.mrb[35].mxu1 }
 0xc97   :  { %1732 = vst.msk [vmem:[%s1766_s7 + $0x10] sm:$0xff] %vm358_vm5, %v1727_v51 }

</bundles_post_ra>
